<compile_context>
chip_gen: v6e
topology: v6e:2x2x1
jax: 0.10.0
libtpu: 0.0.40
codegen_flags: <defaults>
</compile_context>

<pallas_src>
import functools
import math

import jax
import jax.numpy as jnp
from jax import lax
from jax.experimental import pallas as pl
from jax.experimental.pallas import tpu as pltpu

MASK_VALUE = -1e30   # finite "minus infinity": robust against all-masked rows

_WEIGHT_KEYS = ('ln1_w', 'ln1_b', 'w_qkv', 's_qkv', 'b_qkv',
                'w_o', 's_o', 'b_o', 'ln2_w', 'ln2_b',
                'w1', 's1', 'b1', 'w2', 's2', 'b2')


# --------------------------------------------------------------------------
# shared math (used by both the kernel and the pure-JAX reference, so the
# plumbing check compares identical arithmetic)
# --------------------------------------------------------------------------
def _layernorm(x, w, b, eps=1e-5):
    x = x.astype(jnp.float32)
    mu = jnp.mean(x, axis=-1, keepdims=True)
    var = jnp.mean(jnp.square(x - mu), axis=-1, keepdims=True)
    return (x - mu) * lax.rsqrt(var + eps) * w + b


def _gelu(x):
    # TODO(synk): torch nn.GELU defaults to the exact erf formulation; tanh
    # approximation used for robust Mosaic lowering (max abs err ~1e-3).
    c = math.sqrt(2.0 / math.pi)
    return 0.5 * x * (1.0 + jnp.tanh(c * (x + 0.044715 * x * x * x)))


def _mm_q(a, w_q, scale):
    """(..., K) @ int8 (K, N) with per-output-channel scales.

    The int8 weight is widened to bf16 right at the MXU (exact for |q|<=127);
    the scale is applied to the small (tokens, N) result, so the only
    per-weight-element cost is the convert, which hides under the weight DMA.
    """
    lead = a.shape[:-1]
    a2 = a.reshape((-1, a.shape[-1])).astype(jnp.bfloat16)
    w = w_q.astype(jnp.float32).astype(jnp.bfloat16)       # safe int8->f32->bf16 converts
    out = jnp.dot(a2, w, preferred_element_type=jnp.float32) * scale
    return out.reshape(lead + (w_q.shape[-1],))


def _causal_mask(s):
    rows = lax.broadcasted_iota(jnp.int32, (s, s), 0)
    cols = lax.broadcasted_iota(jnp.int32, (s, s), 1)
    return jnp.where(cols > rows, jnp.float32(MASK_VALUE), jnp.float32(0.0))


def _resblock(x, p, num_heads, *, approx_recip):
    """One OpenCLIP ResidualAttentionBlock (pre-LN, causal MHA + GELU MLP)."""
    (ln1w, ln1b, wqkv, sqkv, bqkv, wo, so, bo,
     ln2w, ln2b, w1, s1, b1, w2, s2, b2) = p
    _, S, D = x.shape
    hd = D // num_heads
    scale = 1.0 / math.sqrt(hd)
    mask = _causal_mask(S)                               # built in-kernel, no DMA

    # ---- attention branch: x + out_proj(MHA(ln_1(x), causal mask)) --------
    h = _layernorm(x, ln1w, ln1b)
    qkv = _mm_q(h, wqkv, sqkv) + bqkv                    # fused lane-dense (D, 3D) proj

    heads = []
    for i in range(num_heads):                           # static unroll: only (S,S) work/head
        q = (qkv[:, :, i * hd:(i + 1) * hd] * scale).astype(jnp.bfloat16)
        k = qkv[:, :, D + i * hd:D + (i + 1) * hd].astype(jnp.bfloat16)
        v = qkv[:, :, 2 * D + i * hd:2 * D + (i + 1) * hd].astype(jnp.bfloat16)
        s = jnp.einsum('bqc,bkc->bqk', q, k,
                       preferred_element_type=jnp.float32) + mask
        s = s - jnp.max(s, axis=-1, keepdims=True)
        e = jnp.exp(s)
        denom = jnp.sum(e, axis=-1, keepdims=True)
        # TODO(synk): approx reciprocal (EUP) -> rows sum to 1 within ~2^-12.
        inv = pl.reciprocal(denom, approx=True) if approx_recip else 1.0 / denom
        pr = (e * inv).astype(jnp.bfloat16)
        heads.append(jnp.einsum('bqk,bkc->bqc', pr, v,
                                preferred_element_type=jnp.float32))
    # Concatenated head outputs feed the out-proj matmul directly: no (B,S,D)
    # VMEM scratch and no sub-128-lane masked stores (lane-dense operand).
    attn = jnp.concatenate(heads, axis=-1).astype(jnp.bfloat16)
    x = x + _mm_q(attn, wo, so) + bo                     # single full-width out-proj

    # ---- MLP branch: x + c_proj(gelu(c_fc(ln_2(x)))) -----------------------
    h2 = _layernorm(x, ln2w, ln2b)
    u = _gelu(_mm_q(h2, w1, s1) + b1).astype(jnp.bfloat16)
    x = x + _mm_q(u, w2, s2) + b2
    return x


# --------------------------------------------------------------------------
# fused text-tower kernel: all resblocks + ln_final in one pallas_call
# --------------------------------------------------------------------------
def clip_text_tower_kernel(
        x_hbm, lnf_w_ref, lnf_b_ref,
        ln1w_ref, ln1b_ref, wqkv_ref, sqkv_ref, bqkv_ref,
        wo_ref, so_ref, bo_ref,
        ln2w_ref, ln2b_ref, w1_ref, s1_ref, b1_ref, w2_ref, s2_ref, b2_ref,
        out_ref, copy_sem, *, num_heads):
    layer = pl.program_id(0)
    n_layers = pl.num_programs(0)

    # Layer 0: DMA the embedded tokens from HBM straight into the resident
    # output block; x never occupies its own VMEM window. out_ref then carries
    # the activations across the (arbitrary) layer grid axis.
    @pl.when(layer == 0)
    def _():
        cp = pltpu.make_async_copy(x_hbm, out_ref, copy_sem)
        cp.start()
        cp.wait()

    x = out_ref[...]                                     # (B, S, D) f32
    p = (ln1w_ref[0], ln1b_ref[0], wqkv_ref[0], sqkv_ref[0], bqkv_ref[0],
         wo_ref[0], so_ref[0], bo_ref[0],
         ln2w_ref[0], ln2b_ref[0], w1_ref[0], s1_ref[0], b1_ref[0],
         w2_ref[0], s2_ref[0], b2_ref[0])
    x = _resblock(x, p, num_heads, approx_recip=True)

    # ln_final fused into the last layer (saves a launch + an HBM round trip)
    @pl.when(layer == n_layers - 1)
    def _():
        out_ref[...] = _layernorm(x, lnf_w_ref[...], lnf_b_ref[...])

    @pl.when(layer < n_layers - 1)
    def _():
        out_ref[...] = x


# --------------------------------------------------------------------------
# pallas_call wrapper
# --------------------------------------------------------------------------
def _const_spec(shape):
    r = len(shape)
    return pl.BlockSpec(shape, lambda l, _r=r: (0,) * _r)


def _layer_spec(shape):
    r = len(shape) - 1
    return pl.BlockSpec((1,) + tuple(shape[1:]),
                        lambda l, _r=r: (l,) + (0,) * _r)


def clip_text_tower_call(x, stacked, lnf_w, lnf_b, num_heads):
    B, S, D = x.shape
    L = stacked['ln1_w'].shape[0]
    w_args = tuple(stacked[k] for k in _WEIGHT_KEYS)

    in_specs = ([pl.BlockSpec(memory_space=pl.ANY),      # x stays in HBM; DMA'd at l==0
                 _const_spec(lnf_w.shape),
                 _const_spec(lnf_b.shape)] +
                [_layer_spec(a.shape) for a in w_args])

    # Scoped-VMEM budget derived from the real working set, capped at device
    # VMEM (64 MiB/TC on v7x, 128 MiB on v5e/v6e) minus headroom.
    def _nbytes(a):
        return int(a.size) * a.dtype.itemsize
    tokens = B * S
    per_layer_w = sum(_nbytes(a) // L for a in w_args)   # int8 weights + f32 scales/biases/LN
    bf16_w_peak = 2 * 4 * D * D                          # largest dequantized bf16 matmul operand
    act = (2 * _nbytes(x)                                # resident activation block (+slack)
           + tokens * 7 * D * 4                          # qkv (3D) + MLP hidden (4D), f32
           + tokens * 6 * D * 2                          # bf16 copies feeding the MXU
           + 2 * B * S * S * 4)                          # per-head scores / probabilities
    est = 2 * per_layer_w + bf16_w_peak + act
    try:
        cap = int(pltpu.get_tpu_info().vmem_capacity_bytes)
    except Exception:                                    # info query unavailable -> v7x-safe cap
        cap = 64 << 20
    vmem_limit = int(min(max(int(1.4 * est), 16 << 20), cap - (4 << 20)))

    # NOTE(throughput): weights stream once per layer regardless of token count,
    # so the kernel is weight-HBM-bound below ~240 (v5e) / ~640 (v6e) tokens —
    # batch prompts at the caller to amortize the weight fetch. Only add a
    # parallel token-block grid axis (megacore split on v7x) once compute-bound,
    # otherwise the weight DMA is duplicated for no gain.
    return pl.pallas_call(
        functools.partial(clip_text_tower_kernel, num_heads=num_heads),
        out_shape=jax.ShapeDtypeStruct((B, S, D), jnp.float32),
        grid_spec=pltpu.PrefetchScalarGridSpec(
            num_scalar_prefetch=0,
            grid=(L,),                                   # layer axis: weights streamed
            in_specs=in_specs,
            out_specs=pl.BlockSpec((B, S, D), lambda l: (0, 0, 0)),
            scratch_shapes=[pltpu.SemaphoreType.DMA(())]),
        compiler_params=pltpu.CompilerParams(
            dimension_semantics=("arbitrary",),
            vmem_limit_bytes=vmem_limit),
    )(x, lnf_w, lnf_b, *w_args)


# --------------------------------------------------------------------------
# parameters (deterministic synthetic init; shapes follow the OpenCLIP text
# tower). Matmul weights stored pre-transposed as int8 + per-channel scales;
# biases / LN params / scales in f32.
# --------------------------------------------------------------------------
def _quantize_per_channel(w):
    """f32 (K, N) -> (int8 (K, N), f32 (1, N)) with per-output-channel scales."""
    s = jnp.maximum(jnp.max(jnp.abs(w), axis=0, keepdims=True) / 127.0, 1e-8)
    q = jnp.clip(jnp.round(w / s), -127.0, 127.0).astype(jnp.int8)
    return q, s.astype(jnp.float32)


def init_params(key, vocab, ctx, width, heads, layers):
    del heads  # head split happens inside the kernel on the fused QKV tensor
    mlp = 4 * width
    std = width ** -0.5
    keys = jax.random.split(key, 2 + layers)

    acc = {k: [] for k in _WEIGHT_KEYS if not k.startswith('ln')}
    for l in range(layers):
        bk = jax.random.split(keys[2 + l], 8)
        in_proj_w = std * jax.random.normal(bk[0], (3 * width, width), jnp.float32)
        in_proj_b = 0.02 * jax.random.normal(bk[1], (3 * width,), jnp.float32)
        wo = std * jax.random.normal(bk[2], (width, width), jnp.float32)
        bo = 0.02 * jax.random.normal(bk[3], (width,), jnp.float32)
        w1 = std * jax.random.normal(bk[4], (mlp, width), jnp.float32)      # c_fc
        b1 = 0.02 * jax.random.normal(bk[5], (mlp,), jnp.float32)
        w2 = std * jax.random.normal(bk[6], (width, mlp), jnp.float32)      # c_proj
        b2 = 0.02 * jax.random.normal(bk[7], (width,), jnp.float32)

        q, s = _quantize_per_channel(in_proj_w.T)        # (D, 3D) cols [q|k|v]
        acc['w_qkv'].append(q); acc['s_qkv'].append(s)
        acc['b_qkv'].append(in_proj_b.reshape(1, 3 * width))
        q, s = _quantize_per_channel(wo.T)               # (D, D)
        acc['w_o'].append(q); acc['s_o'].append(s)
        acc['b_o'].append(bo.reshape(1, width))
        q, s = _quantize_per_channel(w1.T)               # (D, 4D)
        acc['w1'].append(q); acc['s1'].append(s)
        acc['b1'].append(b1.reshape(1, mlp))
        q, s = _quantize_per_channel(w2.T)               # (4D, D)
        acc['w2'].append(q); acc['s2'].append(s)
        acc['b2'].append(b2.reshape(1, width))

    blocks = {k: jnp.stack(v, 0) for k, v in acc.items()}
    blocks['ln1_w'] = jnp.ones((layers, 1, width), jnp.float32)
    blocks['ln1_b'] = jnp.zeros((layers, 1, width), jnp.float32)
    blocks['ln2_w'] = jnp.ones((layers, 1, width), jnp.float32)
    blocks['ln2_b'] = jnp.zeros((layers, 1, width), jnp.float32)

    return {
        'token_embedding': 0.02 * jax.random.normal(keys[0], (vocab, width), jnp.float32),
        'positional_embedding': 0.01 * jax.random.normal(keys[1], (ctx, width), jnp.float32),
        'ln_final_w': jnp.ones((1, width), jnp.float32),
        'ln_final_b': jnp.zeros((1, width), jnp.float32),
        'blocks': blocks,
    }


# --------------------------------------------------------------------------
# forward pass == FrozenOpenCLIPEmbedder.encode_with_transformer
# (the torch (S,B,D) permutes are pure layout; math is per-(batch,token))
# --------------------------------------------------------------------------
def frozen_open_clip_embed(tokens, params, num_heads, layer='last'):
    B, S = tokens.shape
    x = params['token_embedding'][tokens] + params['positional_embedding'][None, :S, :]

    # pad S to a multiple of 8 for clean sublane tiling (no-op when aligned);
    # padded key positions are causally masked for every real query and the
    # padded query rows are sliced off at the end.
    S_pad = -(-S // 8) * 8
    if S_pad != S:
        x = jnp.pad(x, ((0, 0), (0, S_pad - S), (0, 0)))

    layer_idx = 0 if layer == 'last' else 1          # 'last' -> all resblocks
    n_use = params['blocks']['ln1_w'].shape[0] - layer_idx
    stacked = {k: v[:n_use] for k, v in params['blocks'].items()}

    z = clip_text_tower_call(x, stacked, params['ln_final_w'],
                             params['ln_final_b'], num_heads)
    return z[:, :S, :]


# --------------------------------------------------------------------------
# pure-JAX reference: identical arithmetic (same int8 weights, bf16 operands,
# exact softmax divide) for a plumbing sanity check.
# --------------------------------------------------------------------------
def _ref_forward(tokens, params, num_heads, layer='last'):
    B, S = tokens.shape
    x = params['token_embedding'][tokens] + params['positional_embedding'][None, :S, :]
    blk = params['blocks']
    layer_idx = 0 if layer == 'last' else 1
    n_use = blk['ln1_w'].shape[0] - layer_idx
    for l in range(n_use):
        p = tuple(blk[k][l] for k in _WEIGHT_KEYS)
        x = _resblock(x, p, num_heads, approx_recip=False)
    return _layernorm(x, params['ln_final_w'], params['ln_final_b'])


# --------------------------------------------------------------------------
if __name__ == "__main__":
    B, S, D, H, L, V = 2, 8, 64, 4, 2, 100   # batch, seq(max_length), width, heads, layers, vocab

    key = jax.random.PRNGKey(0)
    kp, kt = jax.random.split(key)
    params = init_params(kp, vocab=V, ctx=S, width=D, heads=H, layers=L)
    tokens = jax.random.randint(kt, (B, S), 0, V, dtype=jnp.int32)

    z = frozen_open_clip_embed(tokens, params, num_heads=H, layer='last')
    z = jax.block_until_ready(z)

    assert z.shape == (B, S, D), z.shape
    assert bool(jnp.all(jnp.isfinite(z)))
    z_ref = _ref_forward(tokens, params, num_heads=H, layer='last')
    max_err = float(jnp.max(jnp.abs(z - z_ref)))
    assert max_err < 2e-2, f"mismatch vs reference: {max_err}"

    print("KERNEL_OK")
</pallas_src>

<mosaic_0001>
module attributes {stable_mosaic.version = 11 : i64} {
  func.func @clip_text_tower_kernel(%arg0: i32, %arg1: memref<2x8x64xf32, #tpu.memory_space<any>>, %arg2: memref<1x64xf32, #tpu.memory_space<vmem>>, %arg3: memref<1x64xf32, #tpu.memory_space<vmem>>, %arg4: memref<1x1x64xf32, #tpu.memory_space<vmem>>, %arg5: memref<1x1x64xf32, #tpu.memory_space<vmem>>, %arg6: memref<1x64x192xi8, #tpu.memory_space<vmem>>, %arg7: memref<1x1x192xf32, #tpu.memory_space<vmem>>, %arg8: memref<1x1x192xf32, #tpu.memory_space<vmem>>, %arg9: memref<1x64x64xi8, #tpu.memory_space<vmem>>, %arg10: memref<1x1x64xf32, #tpu.memory_space<vmem>>, %arg11: memref<1x1x64xf32, #tpu.memory_space<vmem>>, %arg12: memref<1x1x64xf32, #tpu.memory_space<vmem>>, %arg13: memref<1x1x64xf32, #tpu.memory_space<vmem>>, %arg14: memref<1x64x256xi8, #tpu.memory_space<vmem>>, %arg15: memref<1x1x256xf32, #tpu.memory_space<vmem>>, %arg16: memref<1x1x256xf32, #tpu.memory_space<vmem>>, %arg17: memref<1x256x64xi8, #tpu.memory_space<vmem>>, %arg18: memref<1x1x64xf32, #tpu.memory_space<vmem>>, %arg19: memref<1x1x64xf32, #tpu.memory_space<vmem>>, %arg20: memref<2x8x64xf32, #tpu.memory_space<vmem>>, %arg21: memref<!tpu.dma_semaphore, #tpu.memory_space<semaphore_mem>>) attributes {dimension_semantics = [#tpu.dimension_semantics<arbitrary>], iteration_bounds = array<i64: 2>, scalar_prefetch = 0 : i64, scratch_operands = 1 : i64, tpu.core_type = #tpu.core_type<tc>, window_params = [{}, {pipeline_mode = #tpu.pipeline_mode<synchronous>, transform_indices = @transform_1, window_bounds = array<i64: 1, 64>}, {pipeline_mode = #tpu.pipeline_mode<synchronous>, transform_indices = @transform_2, window_bounds = array<i64: 1, 64>}, {transform_indices = @transform_3, window_bounds = array<i64: 1, 1, 64>}, {transform_indices = @transform_4, window_bounds = array<i64: 1, 1, 64>}, {transform_indices = @transform_5, window_bounds = array<i64: 1, 64, 192>}, {transform_indices = @transform_6, window_bounds = array<i64: 1, 1, 192>}, {transform_indices = @transform_7, window_bounds = array<i64: 1, 1, 192>}, {transform_indices = @transform_8, window_bounds = array<i64: 1, 64, 64>}, {transform_indices = @transform_9, window_bounds = array<i64: 1, 1, 64>}, {transform_indices = @transform_10, window_bounds = array<i64: 1, 1, 64>}, {transform_indices = @transform_11, window_bounds = array<i64: 1, 1, 64>}, {transform_indices = @transform_12, window_bounds = array<i64: 1, 1, 64>}, {transform_indices = @transform_13, window_bounds = array<i64: 1, 64, 256>}, {transform_indices = @transform_14, window_bounds = array<i64: 1, 1, 256>}, {transform_indices = @transform_15, window_bounds = array<i64: 1, 1, 256>}, {transform_indices = @transform_16, window_bounds = array<i64: 1, 256, 64>}, {transform_indices = @transform_17, window_bounds = array<i64: 1, 1, 64>}, {transform_indices = @transform_18, window_bounds = array<i64: 1, 1, 64>}, {pipeline_mode = #tpu.pipeline_mode<synchronous>, transform_indices = @transform_19, window_bounds = array<i64: 2, 8, 64>}]} {
    %c0_i32 = arith.constant 0 : i32
    %0 = arith.cmpi eq, %arg0, %c0_i32 : i32
    %1 = arith.extui %0 : i1 to i32
    %c0_i32_0 = arith.constant 0 : i32
    %2 = arith.cmpi ne, %1, %c0_i32_0 : i32
    scf.if %2 {
      tpu.enqueue_dma source(%arg1 : memref<2x8x64xf32, #tpu.memory_space<any>>) target(%arg20 : memref<2x8x64xf32, #tpu.memory_space<vmem>>) target_semaphore(%arg21 : memref<!tpu.dma_semaphore, #tpu.memory_space<semaphore_mem>>)
      tpu.wait_dma2 semaphore(%arg21 : memref<!tpu.dma_semaphore, #tpu.memory_space<semaphore_mem>>) src(%arg1 : memref<2x8x64xf32, #tpu.memory_space<any>>) dst(%arg20 : memref<2x8x64xf32, #tpu.memory_space<vmem>>)
    } else {
    }
    %c0 = arith.constant 0 : index
    %c0_1 = arith.constant 0 : index
    %c0_2 = arith.constant 0 : index
    %3 = vector.load %arg20[%c0, %c0_1, %c0_2] : memref<2x8x64xf32, #tpu.memory_space<vmem>>, vector<2x8x64xf32>
    %c0_3 = arith.constant 0 : index
    %c0_4 = arith.constant 0 : index
    %c0_5 = arith.constant 0 : index
    %4 = vector.load %arg4[%c0_3, %c0_4, %c0_5] : memref<1x1x64xf32, #tpu.memory_space<vmem>>, vector<1x1x64xf32>
    %5 = vector.shape_cast %4 : vector<1x1x64xf32> to vector<1x64xf32>
    %c0_6 = arith.constant 0 : index
    %c0_7 = arith.constant 0 : index
    %c0_8 = arith.constant 0 : index
    %6 = vector.load %arg5[%c0_6, %c0_7, %c0_8] : memref<1x1x64xf32, #tpu.memory_space<vmem>>, vector<1x1x64xf32>
    %7 = vector.shape_cast %6 : vector<1x1x64xf32> to vector<1x64xf32>
    %c0_9 = arith.constant 0 : index
    %c0_10 = arith.constant 0 : index
    %c0_11 = arith.constant 0 : index
    %8 = vector.load %arg6[%c0_9, %c0_10, %c0_11] : memref<1x64x192xi8, #tpu.memory_space<vmem>>, vector<1x64x192xi8>
    %9 = vector.shape_cast %8 : vector<1x64x192xi8> to vector<64x192xi8>
    %c0_12 = arith.constant 0 : index
    %c0_13 = arith.constant 0 : index
    %c0_14 = arith.constant 0 : index
    %10 = vector.load %arg7[%c0_12, %c0_13, %c0_14] : memref<1x1x192xf32, #tpu.memory_space<vmem>>, vector<1x1x192xf32>
    %11 = vector.shape_cast %10 : vector<1x1x192xf32> to vector<1x192xf32>
    %c0_15 = arith.constant 0 : index
    %c0_16 = arith.constant 0 : index
    %c0_17 = arith.constant 0 : index
    %12 = vector.load %arg8[%c0_15, %c0_16, %c0_17] : memref<1x1x192xf32, #tpu.memory_space<vmem>>, vector<1x1x192xf32>
    %13 = vector.shape_cast %12 : vector<1x1x192xf32> to vector<1x192xf32>
    %c0_18 = arith.constant 0 : index
    %c0_19 = arith.constant 0 : index
    %c0_20 = arith.constant 0 : index
    %14 = vector.load %arg9[%c0_18, %c0_19, %c0_20] : memref<1x64x64xi8, #tpu.memory_space<vmem>>, vector<1x64x64xi8>
    %15 = vector.shape_cast %14 : vector<1x64x64xi8> to vector<64x64xi8>
    %c0_21 = arith.constant 0 : index
    %c0_22 = arith.constant 0 : index
    %c0_23 = arith.constant 0 : index
    %16 = vector.load %arg10[%c0_21, %c0_22, %c0_23] : memref<1x1x64xf32, #tpu.memory_space<vmem>>, vector<1x1x64xf32>
    %17 = vector.shape_cast %16 : vector<1x1x64xf32> to vector<1x64xf32>
    %c0_24 = arith.constant 0 : index
    %c0_25 = arith.constant 0 : index
    %c0_26 = arith.constant 0 : index
    %18 = vector.load %arg11[%c0_24, %c0_25, %c0_26] : memref<1x1x64xf32, #tpu.memory_space<vmem>>, vector<1x1x64xf32>
    %19 = vector.shape_cast %18 : vector<1x1x64xf32> to vector<1x64xf32>
    %c0_27 = arith.constant 0 : index
    %c0_28 = arith.constant 0 : index
    %c0_29 = arith.constant 0 : index
    %20 = vector.load %arg12[%c0_27, %c0_28, %c0_29] : memref<1x1x64xf32, #tpu.memory_space<vmem>>, vector<1x1x64xf32>
    %21 = vector.shape_cast %20 : vector<1x1x64xf32> to vector<1x64xf32>
    %c0_30 = arith.constant 0 : index
    %c0_31 = arith.constant 0 : index
    %c0_32 = arith.constant 0 : index
    %22 = vector.load %arg13[%c0_30, %c0_31, %c0_32] : memref<1x1x64xf32, #tpu.memory_space<vmem>>, vector<1x1x64xf32>
    %23 = vector.shape_cast %22 : vector<1x1x64xf32> to vector<1x64xf32>
    %c0_33 = arith.constant 0 : index
    %c0_34 = arith.constant 0 : index
    %c0_35 = arith.constant 0 : index
    %24 = vector.load %arg14[%c0_33, %c0_34, %c0_35] : memref<1x64x256xi8, #tpu.memory_space<vmem>>, vector<1x64x256xi8>
    %25 = vector.shape_cast %24 : vector<1x64x256xi8> to vector<64x256xi8>
    %c0_36 = arith.constant 0 : index
    %c0_37 = arith.constant 0 : index
    %c0_38 = arith.constant 0 : index
    %26 = vector.load %arg15[%c0_36, %c0_37, %c0_38] : memref<1x1x256xf32, #tpu.memory_space<vmem>>, vector<1x1x256xf32>
    %27 = vector.shape_cast %26 : vector<1x1x256xf32> to vector<1x256xf32>
    %c0_39 = arith.constant 0 : index
    %c0_40 = arith.constant 0 : index
    %c0_41 = arith.constant 0 : index
    %28 = vector.load %arg16[%c0_39, %c0_40, %c0_41] : memref<1x1x256xf32, #tpu.memory_space<vmem>>, vector<1x1x256xf32>
    %29 = vector.shape_cast %28 : vector<1x1x256xf32> to vector<1x256xf32>
    %c0_42 = arith.constant 0 : index
    %c0_43 = arith.constant 0 : index
    %c0_44 = arith.constant 0 : index
    %30 = vector.load %arg17[%c0_42, %c0_43, %c0_44] : memref<1x256x64xi8, #tpu.memory_space<vmem>>, vector<1x256x64xi8>
    %31 = vector.shape_cast %30 : vector<1x256x64xi8> to vector<256x64xi8>
    %c0_45 = arith.constant 0 : index
    %c0_46 = arith.constant 0 : index
    %c0_47 = arith.constant 0 : index
    %32 = vector.load %arg18[%c0_45, %c0_46, %c0_47] : memref<1x1x64xf32, #tpu.memory_space<vmem>>, vector<1x1x64xf32>
    %33 = vector.shape_cast %32 : vector<1x1x64xf32> to vector<1x64xf32>
    %c0_48 = arith.constant 0 : index
    %c0_49 = arith.constant 0 : index
    %c0_50 = arith.constant 0 : index
    %34 = vector.load %arg19[%c0_48, %c0_49, %c0_50] : memref<1x1x64xf32, #tpu.memory_space<vmem>>, vector<1x1x64xf32>
    %35 = vector.shape_cast %34 : vector<1x1x64xf32> to vector<1x64xf32>
    %36 = tpu.iota {dimensions = array<i32: 0>} : vector<8x8xi32>
    %37 = tpu.iota {dimensions = array<i32: 1>} : vector<8x8xi32>
    %38 = arith.cmpi sgt, %37, %36 : vector<8x8xi32>
    %cst = arith.constant -1.000000e+30 : f32
    %cst_51 = arith.constant 0.000000e+00 : f32
    %39 = vector.broadcast %cst : f32 to vector<8x8xf32>
    %40 = vector.broadcast %cst_51 : f32 to vector<8x8xf32>
    %41 = arith.select %38, %39, %40 : vector<8x8xi1>, vector<8x8xf32>
    %cst_52 = arith.constant dense<0.000000e+00> : vector<2x8xf32>
    %42 = vector.multi_reduction <add>, %3, %cst_52 [2] : vector<2x8x64xf32> to vector<2x8xf32>
    %43 = vector.shape_cast %42 : vector<2x8xf32> to vector<2x8x1xf32>
    %cst_53 = arith.constant 6.400000e+01 : f32
    %44 = vector.broadcast %cst_53 : f32 to vector<2x8x1xf32>
    %45 = arith.divf %43, %44 : vector<2x8x1xf32>
    %46 = vector.broadcast %45 : vector<2x8x1xf32> to vector<2x8x64xf32>
    %47 = arith.subf %3, %46 : vector<2x8x64xf32>
    %48 = arith.mulf %47, %47 : vector<2x8x64xf32>
    %cst_54 = arith.constant dense<0.000000e+00> : vector<2x8xf32>
    %49 = vector.multi_reduction <add>, %48, %cst_54 [2] : vector<2x8x64xf32> to vector<2x8xf32>
    %50 = vector.shape_cast %49 : vector<2x8xf32> to vector<2x8x1xf32>
    %cst_55 = arith.constant 6.400000e+01 : f32
    %51 = vector.broadcast %cst_55 : f32 to vector<2x8x1xf32>
    %52 = arith.divf %50, %51 : vector<2x8x1xf32>
    %53 = vector.broadcast %45 : vector<2x8x1xf32> to vector<2x8x64xf32>
    %54 = arith.subf %3, %53 : vector<2x8x64xf32>
    %cst_56 = arith.constant 9.99999974E-6 : f32
    %55 = vector.broadcast %cst_56 : f32 to vector<2x8x1xf32>
    %56 = arith.addf %52, %55 : vector<2x8x1xf32>
    %57 = math.rsqrt %56 : vector<2x8x1xf32>
    %58 = vector.broadcast %57 : vector<2x8x1xf32> to vector<2x8x64xf32>
    %59 = arith.mulf %54, %58 : vector<2x8x64xf32>
    %60 = vector.shape_cast %5 : vector<1x64xf32> to vector<1x1x64xf32>
    %61 = vector.broadcast %60 : vector<1x1x64xf32> to vector<2x8x64xf32>
    %62 = arith.mulf %59, %61 : vector<2x8x64xf32>
    %63 = vector.shape_cast %7 : vector<1x64xf32> to vector<1x1x64xf32>
    %64 = vector.broadcast %63 : vector<1x1x64xf32> to vector<2x8x64xf32>
    %65 = arith.addf %62, %64 : vector<2x8x64xf32>
    %66 = vector.shape_cast %65 : vector<2x8x64xf32> to vector<16x64xf32>
    %67 = arith.truncf %66 : vector<16x64xf32> to vector<16x64xbf16>
    %68 = arith.sitofp %9 : vector<64x192xi8> to vector<64x192xf32>
    %69 = arith.truncf %68 : vector<64x192xf32> to vector<64x192xbf16>
    %cst_57 = arith.constant dense<0.000000e+00> : vector<16x192xf32>
    %70 = tpu.matmul %67, %69, %cst_57 {dimension_numbers = #tpu.dot_dimension_numbers<[1], [0], [0], [1], [0, 0, 1, 1], [], []>} : vector<16x64xbf16>, vector<64x192xbf16>, vector<16x192xf32> -> vector<16x192xf32>
    %71 = vector.broadcast %11 : vector<1x192xf32> to vector<16x192xf32>
    %72 = arith.mulf %70, %71 : vector<16x192xf32>
    %73 = vector.shape_cast %72 : vector<16x192xf32> to vector<2x8x192xf32>
    %74 = vector.shape_cast %13 : vector<1x192xf32> to vector<1x1x192xf32>
    %75 = vector.broadcast %74 : vector<1x1x192xf32> to vector<2x8x192xf32>
    %76 = arith.addf %73, %75 : vector<2x8x192xf32>
    %77 = vector.extract_strided_slice %76 {offsets = [0, 0, 0], sizes = [2, 8, 16], strides = [1, 1, 1]} : vector<2x8x192xf32> to vector<2x8x16xf32>
    %cst_58 = arith.constant 2.500000e-01 : f32
    %78 = vector.broadcast %cst_58 : f32 to vector<2x8x16xf32>
    %79 = arith.mulf %77, %78 : vector<2x8x16xf32>
    %80 = arith.truncf %79 : vector<2x8x16xf32> to vector<2x8x16xbf16>
    %81 = vector.extract_strided_slice %76 {offsets = [0, 0, 64], sizes = [2, 8, 16], strides = [1, 1, 1]} : vector<2x8x192xf32> to vector<2x8x16xf32>
    %82 = arith.truncf %81 : vector<2x8x16xf32> to vector<2x8x16xbf16>
    %83 = vector.extract_strided_slice %76 {offsets = [0, 0, 128], sizes = [2, 8, 16], strides = [1, 1, 1]} : vector<2x8x192xf32> to vector<2x8x16xf32>
    %84 = arith.truncf %83 : vector<2x8x16xf32> to vector<2x8x16xbf16>
    "tpu.trace_start"() <{level = 10 : i32, message = "bqc,bkc->bqk"}> : () -> ()
    %cst_59 = arith.constant dense<0.000000e+00> : vector<2x8x8xf32>
    %85 = tpu.matmul %80, %82, %cst_59 {dimension_numbers = #tpu.dot_dimension_numbers<[2], [2], [1], [1], [0, 0, 0, 1, 1, 1], [0], [0]>} : vector<2x8x16xbf16>, vector<2x8x16xbf16>, vector<2x8x8xf32> -> vector<2x8x8xf32>
    "tpu.trace_stop"() : () -> ()
    %86 = vector.shape_cast %41 : vector<8x8xf32> to vector<1x8x8xf32>
    %87 = vector.broadcast %86 : vector<1x8x8xf32> to vector<2x8x8xf32>
    %88 = arith.addf %85, %87 : vector<2x8x8xf32>
    %cst_60 = arith.constant dense<0xFF800000> : vector<2x8xf32>
    %89 = vector.multi_reduction <maximumf>, %88, %cst_60 [2] : vector<2x8x8xf32> to vector<2x8xf32>
    %90 = vector.shape_cast %89 : vector<2x8xf32> to vector<2x8x1xf32>
    %91 = vector.broadcast %90 : vector<2x8x1xf32> to vector<2x8x8xf32>
    %92 = arith.subf %88, %91 : vector<2x8x8xf32>
    %93 = math.exp %92 : vector<2x8x8xf32>
    %cst_61 = arith.constant dense<0.000000e+00> : vector<2x8xf32>
    %94 = vector.multi_reduction <add>, %93, %cst_61 [2] : vector<2x8x8xf32> to vector<2x8xf32>
    %95 = vector.shape_cast %94 : vector<2x8xf32> to vector<2x8x1xf32>
    %96 = tpu.reciprocal %95 {approx = true} : vector<2x8x1xf32> -> vector<2x8x1xf32>
    %97 = vector.broadcast %96 : vector<2x8x1xf32> to vector<2x8x8xf32>
    %98 = arith.mulf %93, %97 : vector<2x8x8xf32>
    %99 = arith.truncf %98 : vector<2x8x8xf32> to vector<2x8x8xbf16>
    "tpu.trace_start"() <{level = 10 : i32, message = "bqk,bkc->bqc"}> : () -> ()
    %cst_62 = arith.constant dense<0.000000e+00> : vector<2x8x16xf32>
    %100 = tpu.matmul %99, %84, %cst_62 {dimension_numbers = #tpu.dot_dimension_numbers<[2], [1], [1], [2], [0, 0, 0, 1, 1, 2], [0], [0]>} : vector<2x8x8xbf16>, vector<2x8x16xbf16>, vector<2x8x16xf32> -> vector<2x8x16xf32>
    "tpu.trace_stop"() : () -> ()
    %101 = vector.extract_strided_slice %76 {offsets = [0, 0, 16], sizes = [2, 8, 16], strides = [1, 1, 1]} : vector<2x8x192xf32> to vector<2x8x16xf32>
    %cst_63 = arith.constant 2.500000e-01 : f32
    %102 = vector.broadcast %cst_63 : f32 to vector<2x8x16xf32>
    %103 = arith.mulf %101, %102 : vector<2x8x16xf32>
    %104 = arith.truncf %103 : vector<2x8x16xf32> to vector<2x8x16xbf16>
    %105 = vector.extract_strided_slice %76 {offsets = [0, 0, 80], sizes = [2, 8, 16], strides = [1, 1, 1]} : vector<2x8x192xf32> to vector<2x8x16xf32>
    %106 = arith.truncf %105 : vector<2x8x16xf32> to vector<2x8x16xbf16>
    %107 = vector.extract_strided_slice %76 {offsets = [0, 0, 144], sizes = [2, 8, 16], strides = [1, 1, 1]} : vector<2x8x192xf32> to vector<2x8x16xf32>
    %108 = arith.truncf %107 : vector<2x8x16xf32> to vector<2x8x16xbf16>
    "tpu.trace_start"() <{level = 10 : i32, message = "bqc,bkc->bqk"}> : () -> ()
    %cst_64 = arith.constant dense<0.000000e+00> : vector<2x8x8xf32>
    %109 = tpu.matmul %104, %106, %cst_64 {dimension_numbers = #tpu.dot_dimension_numbers<[2], [2], [1], [1], [0, 0, 0, 1, 1, 1], [0], [0]>} : vector<2x8x16xbf16>, vector<2x8x16xbf16>, vector<2x8x8xf32> -> vector<2x8x8xf32>
    "tpu.trace_stop"() : () -> ()
    %110 = vector.shape_cast %41 : vector<8x8xf32> to vector<1x8x8xf32>
    %111 = vector.broadcast %110 : vector<1x8x8xf32> to vector<2x8x8xf32>
    %112 = arith.addf %109, %111 : vector<2x8x8xf32>
    %cst_65 = arith.constant dense<0xFF800000> : vector<2x8xf32>
    %113 = vector.multi_reduction <maximumf>, %112, %cst_65 [2] : vector<2x8x8xf32> to vector<2x8xf32>
    %114 = vector.shape_cast %113 : vector<2x8xf32> to vector<2x8x1xf32>
    %115 = vector.broadcast %114 : vector<2x8x1xf32> to vector<2x8x8xf32>
    %116 = arith.subf %112, %115 : vector<2x8x8xf32>
    %117 = math.exp %116 : vector<2x8x8xf32>
    %cst_66 = arith.constant dense<0.000000e+00> : vector<2x8xf32>
    %118 = vector.multi_reduction <add>, %117, %cst_66 [2] : vector<2x8x8xf32> to vector<2x8xf32>
    %119 = vector.shape_cast %118 : vector<2x8xf32> to vector<2x8x1xf32>
    %120 = tpu.reciprocal %119 {approx = true} : vector<2x8x1xf32> -> vector<2x8x1xf32>
    %121 = vector.broadcast %120 : vector<2x8x1xf32> to vector<2x8x8xf32>
    %122 = arith.mulf %117, %121 : vector<2x8x8xf32>
    %123 = arith.truncf %122 : vector<2x8x8xf32> to vector<2x8x8xbf16>
    "tpu.trace_start"() <{level = 10 : i32, message = "bqk,bkc->bqc"}> : () -> ()
    %cst_67 = arith.constant dense<0.000000e+00> : vector<2x8x16xf32>
    %124 = tpu.matmul %123, %108, %cst_67 {dimension_numbers = #tpu.dot_dimension_numbers<[2], [1], [1], [2], [0, 0, 0, 1, 1, 2], [0], [0]>} : vector<2x8x8xbf16>, vector<2x8x16xbf16>, vector<2x8x16xf32> -> vector<2x8x16xf32>
    "tpu.trace_stop"() : () -> ()
    %125 = vector.extract_strided_slice %76 {offsets = [0, 0, 32], sizes = [2, 8, 16], strides = [1, 1, 1]} : vector<2x8x192xf32> to vector<2x8x16xf32>
    %cst_68 = arith.constant 2.500000e-01 : f32
    %126 = vector.broadcast %cst_68 : f32 to vector<2x8x16xf32>
    %127 = arith.mulf %125, %126 : vector<2x8x16xf32>
    %128 = arith.truncf %127 : vector<2x8x16xf32> to vector<2x8x16xbf16>
    %129 = vector.extract_strided_slice %76 {offsets = [0, 0, 96], sizes = [2, 8, 16], strides = [1, 1, 1]} : vector<2x8x192xf32> to vector<2x8x16xf32>
    %130 = arith.truncf %129 : vector<2x8x16xf32> to vector<2x8x16xbf16>
    %131 = vector.extract_strided_slice %76 {offsets = [0, 0, 160], sizes = [2, 8, 16], strides = [1, 1, 1]} : vector<2x8x192xf32> to vector<2x8x16xf32>
    %132 = arith.truncf %131 : vector<2x8x16xf32> to vector<2x8x16xbf16>
    "tpu.trace_start"() <{level = 10 : i32, message = "bqc,bkc->bqk"}> : () -> ()
    %cst_69 = arith.constant dense<0.000000e+00> : vector<2x8x8xf32>
    %133 = tpu.matmul %128, %130, %cst_69 {dimension_numbers = #tpu.dot_dimension_numbers<[2], [2], [1], [1], [0, 0, 0, 1, 1, 1], [0], [0]>} : vector<2x8x16xbf16>, vector<2x8x16xbf16>, vector<2x8x8xf32> -> vector<2x8x8xf32>
    "tpu.trace_stop"() : () -> ()
    %134 = vector.shape_cast %41 : vector<8x8xf32> to vector<1x8x8xf32>
    %135 = vector.broadcast %134 : vector<1x8x8xf32> to vector<2x8x8xf32>
    %136 = arith.addf %133, %135 : vector<2x8x8xf32>
    %cst_70 = arith.constant dense<0xFF800000> : vector<2x8xf32>
    %137 = vector.multi_reduction <maximumf>, %136, %cst_70 [2] : vector<2x8x8xf32> to vector<2x8xf32>
    %138 = vector.shape_cast %137 : vector<2x8xf32> to vector<2x8x1xf32>
    %139 = vector.broadcast %138 : vector<2x8x1xf32> to vector<2x8x8xf32>
    %140 = arith.subf %136, %139 : vector<2x8x8xf32>
    %141 = math.exp %140 : vector<2x8x8xf32>
    %cst_71 = arith.constant dense<0.000000e+00> : vector<2x8xf32>
    %142 = vector.multi_reduction <add>, %141, %cst_71 [2] : vector<2x8x8xf32> to vector<2x8xf32>
    %143 = vector.shape_cast %142 : vector<2x8xf32> to vector<2x8x1xf32>
    %144 = tpu.reciprocal %143 {approx = true} : vector<2x8x1xf32> -> vector<2x8x1xf32>
    %145 = vector.broadcast %144 : vector<2x8x1xf32> to vector<2x8x8xf32>
    %146 = arith.mulf %141, %145 : vector<2x8x8xf32>
    %147 = arith.truncf %146 : vector<2x8x8xf32> to vector<2x8x8xbf16>
    "tpu.trace_start"() <{level = 10 : i32, message = "bqk,bkc->bqc"}> : () -> ()
    %cst_72 = arith.constant dense<0.000000e+00> : vector<2x8x16xf32>
    %148 = tpu.matmul %147, %132, %cst_72 {dimension_numbers = #tpu.dot_dimension_numbers<[2], [1], [1], [2], [0, 0, 0, 1, 1, 2], [0], [0]>} : vector<2x8x8xbf16>, vector<2x8x16xbf16>, vector<2x8x16xf32> -> vector<2x8x16xf32>
    "tpu.trace_stop"() : () -> ()
    %149 = vector.extract_strided_slice %76 {offsets = [0, 0, 48], sizes = [2, 8, 16], strides = [1, 1, 1]} : vector<2x8x192xf32> to vector<2x8x16xf32>
    %cst_73 = arith.constant 2.500000e-01 : f32
    %150 = vector.broadcast %cst_73 : f32 to vector<2x8x16xf32>
    %151 = arith.mulf %149, %150 : vector<2x8x16xf32>
    %152 = arith.truncf %151 : vector<2x8x16xf32> to vector<2x8x16xbf16>
    %153 = vector.extract_strided_slice %76 {offsets = [0, 0, 112], sizes = [2, 8, 16], strides = [1, 1, 1]} : vector<2x8x192xf32> to vector<2x8x16xf32>
    %154 = arith.truncf %153 : vector<2x8x16xf32> to vector<2x8x16xbf16>
    %155 = vector.extract_strided_slice %76 {offsets = [0, 0, 176], sizes = [2, 8, 16], strides = [1, 1, 1]} : vector<2x8x192xf32> to vector<2x8x16xf32>
    %156 = arith.truncf %155 : vector<2x8x16xf32> to vector<2x8x16xbf16>
    "tpu.trace_start"() <{level = 10 : i32, message = "bqc,bkc->bqk"}> : () -> ()
    %cst_74 = arith.constant dense<0.000000e+00> : vector<2x8x8xf32>
    %157 = tpu.matmul %152, %154, %cst_74 {dimension_numbers = #tpu.dot_dimension_numbers<[2], [2], [1], [1], [0, 0, 0, 1, 1, 1], [0], [0]>} : vector<2x8x16xbf16>, vector<2x8x16xbf16>, vector<2x8x8xf32> -> vector<2x8x8xf32>
    "tpu.trace_stop"() : () -> ()
    %158 = vector.shape_cast %41 : vector<8x8xf32> to vector<1x8x8xf32>
    %159 = vector.broadcast %158 : vector<1x8x8xf32> to vector<2x8x8xf32>
    %160 = arith.addf %157, %159 : vector<2x8x8xf32>
    %cst_75 = arith.constant dense<0xFF800000> : vector<2x8xf32>
    %161 = vector.multi_reduction <maximumf>, %160, %cst_75 [2] : vector<2x8x8xf32> to vector<2x8xf32>
    %162 = vector.shape_cast %161 : vector<2x8xf32> to vector<2x8x1xf32>
    %163 = vector.broadcast %162 : vector<2x8x1xf32> to vector<2x8x8xf32>
    %164 = arith.subf %160, %163 : vector<2x8x8xf32>
    %165 = math.exp %164 : vector<2x8x8xf32>
    %cst_76 = arith.constant dense<0.000000e+00> : vector<2x8xf32>
    %166 = vector.multi_reduction <add>, %165, %cst_76 [2] : vector<2x8x8xf32> to vector<2x8xf32>
    %167 = vector.shape_cast %166 : vector<2x8xf32> to vector<2x8x1xf32>
    %168 = tpu.reciprocal %167 {approx = true} : vector<2x8x1xf32> -> vector<2x8x1xf32>
    %169 = vector.broadcast %168 : vector<2x8x1xf32> to vector<2x8x8xf32>
    %170 = arith.mulf %165, %169 : vector<2x8x8xf32>
    %171 = arith.truncf %170 : vector<2x8x8xf32> to vector<2x8x8xbf16>
    "tpu.trace_start"() <{level = 10 : i32, message = "bqk,bkc->bqc"}> : () -> ()
    %cst_77 = arith.constant dense<0.000000e+00> : vector<2x8x16xf32>
    %172 = tpu.matmul %171, %156, %cst_77 {dimension_numbers = #tpu.dot_dimension_numbers<[2], [1], [1], [2], [0, 0, 0, 1, 1, 2], [0], [0]>} : vector<2x8x8xbf16>, vector<2x8x16xbf16>, vector<2x8x16xf32> -> vector<2x8x16xf32>
    "tpu.trace_stop"() : () -> ()
    %173 = tpu.concatenate %100, %124, %148, %172 in 2 : vector<2x8x16xf32>, vector<2x8x16xf32>, vector<2x8x16xf32>, vector<2x8x16xf32> -> vector<2x8x64xf32>
    %174 = arith.truncf %173 : vector<2x8x64xf32> to vector<2x8x64xbf16>
    %175 = vector.shape_cast %174 : vector<2x8x64xbf16> to vector<16x64xbf16>
    %176 = arith.sitofp %15 : vector<64x64xi8> to vector<64x64xf32>
    %177 = arith.truncf %176 : vector<64x64xf32> to vector<64x64xbf16>
    %cst_78 = arith.constant dense<0.000000e+00> : vector<16x64xf32>
    %178 = tpu.matmul %175, %177, %cst_78 {dimension_numbers = #tpu.dot_dimension_numbers<[1], [0], [0], [1], [0, 0, 1, 1], [], []>} : vector<16x64xbf16>, vector<64x64xbf16>, vector<16x64xf32> -> vector<16x64xf32>
    %179 = vector.broadcast %17 : vector<1x64xf32> to vector<16x64xf32>
    %180 = arith.mulf %178, %179 : vector<16x64xf32>
    %181 = vector.shape_cast %180 : vector<16x64xf32> to vector<2x8x64xf32>
    %182 = arith.addf %3, %181 : vector<2x8x64xf32>
    %183 = vector.shape_cast %19 : vector<1x64xf32> to vector<1x1x64xf32>
    %184 = vector.broadcast %183 : vector<1x1x64xf32> to vector<2x8x64xf32>
    %185 = arith.addf %182, %184 : vector<2x8x64xf32>
    %cst_79 = arith.constant dense<0.000000e+00> : vector<2x8xf32>
    %186 = vector.multi_reduction <add>, %185, %cst_79 [2] : vector<2x8x64xf32> to vector<2x8xf32>
    %187 = vector.shape_cast %186 : vector<2x8xf32> to vector<2x8x1xf32>
    %cst_80 = arith.constant 6.400000e+01 : f32
    %188 = vector.broadcast %cst_80 : f32 to vector<2x8x1xf32>
    %189 = arith.divf %187, %188 : vector<2x8x1xf32>
    %190 = vector.broadcast %189 : vector<2x8x1xf32> to vector<2x8x64xf32>
    %191 = arith.subf %185, %190 : vector<2x8x64xf32>
    %192 = arith.mulf %191, %191 : vector<2x8x64xf32>
    %cst_81 = arith.constant dense<0.000000e+00> : vector<2x8xf32>
    %193 = vector.multi_reduction <add>, %192, %cst_81 [2] : vector<2x8x64xf32> to vector<2x8xf32>
    %194 = vector.shape_cast %193 : vector<2x8xf32> to vector<2x8x1xf32>
    %cst_82 = arith.constant 6.400000e+01 : f32
    %195 = vector.broadcast %cst_82 : f32 to vector<2x8x1xf32>
    %196 = arith.divf %194, %195 : vector<2x8x1xf32>
    %197 = vector.broadcast %189 : vector<2x8x1xf32> to vector<2x8x64xf32>
    %198 = arith.subf %185, %197 : vector<2x8x64xf32>
    %cst_83 = arith.constant 9.99999974E-6 : f32
    %199 = vector.broadcast %cst_83 : f32 to vector<2x8x1xf32>
    %200 = arith.addf %196, %199 : vector<2x8x1xf32>
    %201 = math.rsqrt %200 : vector<2x8x1xf32>
    %202 = vector.broadcast %201 : vector<2x8x1xf32> to vector<2x8x64xf32>
    %203 = arith.mulf %198, %202 : vector<2x8x64xf32>
    %204 = vector.shape_cast %21 : vector<1x64xf32> to vector<1x1x64xf32>
    %205 = vector.broadcast %204 : vector<1x1x64xf32> to vector<2x8x64xf32>
    %206 = arith.mulf %203, %205 : vector<2x8x64xf32>
    %207 = vector.shape_cast %23 : vector<1x64xf32> to vector<1x1x64xf32>
    %208 = vector.broadcast %207 : vector<1x1x64xf32> to vector<2x8x64xf32>
    %209 = arith.addf %206, %208 : vector<2x8x64xf32>
    %210 = vector.shape_cast %209 : vector<2x8x64xf32> to vector<16x64xf32>
    %211 = arith.truncf %210 : vector<16x64xf32> to vector<16x64xbf16>
    %212 = arith.sitofp %25 : vector<64x256xi8> to vector<64x256xf32>
    %213 = arith.truncf %212 : vector<64x256xf32> to vector<64x256xbf16>
    %cst_84 = arith.constant dense<0.000000e+00> : vector<16x256xf32>
    %214 = tpu.matmul %211, %213, %cst_84 {dimension_numbers = #tpu.dot_dimension_numbers<[1], [0], [0], [1], [0, 0, 1, 1], [], []>} : vector<16x64xbf16>, vector<64x256xbf16>, vector<16x256xf32> -> vector<16x256xf32>
    %215 = vector.broadcast %27 : vector<1x256xf32> to vector<16x256xf32>
    %216 = arith.mulf %214, %215 : vector<16x256xf32>
    %217 = vector.shape_cast %216 : vector<16x256xf32> to vector<2x8x256xf32>
    %218 = vector.shape_cast %29 : vector<1x256xf32> to vector<1x1x256xf32>
    %219 = vector.broadcast %218 : vector<1x1x256xf32> to vector<2x8x256xf32>
    %220 = arith.addf %217, %219 : vector<2x8x256xf32>
    %cst_85 = arith.constant 5.000000e-01 : f32
    %221 = vector.broadcast %cst_85 : f32 to vector<2x8x256xf32>
    %222 = arith.mulf %221, %220 : vector<2x8x256xf32>
    %cst_86 = arith.constant 4.471500e-02 : f32
    %223 = vector.broadcast %cst_86 : f32 to vector<2x8x256xf32>
    %224 = arith.mulf %223, %220 : vector<2x8x256xf32>
    %225 = arith.mulf %224, %220 : vector<2x8x256xf32>
    %226 = arith.mulf %225, %220 : vector<2x8x256xf32>
    %227 = arith.addf %220, %226 : vector<2x8x256xf32>
    %cst_87 = arith.constant 0.797884583 : f32
    %228 = vector.broadcast %cst_87 : f32 to vector<2x8x256xf32>
    %229 = arith.mulf %228, %227 : vector<2x8x256xf32>
    %230 = math.tanh %229 : vector<2x8x256xf32>
    %cst_88 = arith.constant 1.000000e+00 : f32
    %231 = vector.broadcast %cst_88 : f32 to vector<2x8x256xf32>
    %232 = arith.addf %231, %230 : vector<2x8x256xf32>
    %233 = arith.mulf %222, %232 : vector<2x8x256xf32>
    %234 = arith.truncf %233 : vector<2x8x256xf32> to vector<2x8x256xbf16>
    %235 = vector.shape_cast %234 : vector<2x8x256xbf16> to vector<16x256xbf16>
    %236 = arith.sitofp %31 : vector<256x64xi8> to vector<256x64xf32>
    %237 = arith.truncf %236 : vector<256x64xf32> to vector<256x64xbf16>
    %cst_89 = arith.constant dense<0.000000e+00> : vector<16x64xf32>
    %238 = tpu.matmul %235, %237, %cst_89 {dimension_numbers = #tpu.dot_dimension_numbers<[1], [0], [0], [1], [0, 0, 1, 1], [], []>} : vector<16x256xbf16>, vector<256x64xbf16>, vector<16x64xf32> -> vector<16x64xf32>
    %239 = vector.broadcast %33 : vector<1x64xf32> to vector<16x64xf32>
    %240 = arith.mulf %238, %239 : vector<16x64xf32>
    %241 = vector.shape_cast %240 : vector<16x64xf32> to vector<2x8x64xf32>
    %242 = arith.addf %185, %241 : vector<2x8x64xf32>
    %243 = vector.shape_cast %35 : vector<1x64xf32> to vector<1x1x64xf32>
    %244 = vector.broadcast %243 : vector<1x1x64xf32> to vector<2x8x64xf32>
    %245 = arith.addf %242, %244 : vector<2x8x64xf32>
    %c1_i32 = arith.constant 1 : i32
    %246 = arith.cmpi eq, %arg0, %c1_i32 : i32
    %247 = arith.extui %246 : i1 to i32
    %c0_i32_90 = arith.constant 0 : i32
    %248 = arith.cmpi ne, %247, %c0_i32_90 : i32
    scf.if %248 {
      %c0_93 = arith.constant 0 : index
      %c0_94 = arith.constant 0 : index
      %252 = vector.load %arg2[%c0_93, %c0_94] : memref<1x64xf32, #tpu.memory_space<vmem>>, vector<1x64xf32>
      %c0_95 = arith.constant 0 : index
      %c0_96 = arith.constant 0 : index
      %253 = vector.load %arg3[%c0_95, %c0_96] : memref<1x64xf32, #tpu.memory_space<vmem>>, vector<1x64xf32>
      %cst_97 = arith.constant dense<0.000000e+00> : vector<2x8xf32>
      %254 = vector.multi_reduction <add>, %245, %cst_97 [2] : vector<2x8x64xf32> to vector<2x8xf32>
      %255 = vector.shape_cast %254 : vector<2x8xf32> to vector<2x8x1xf32>
      %cst_98 = arith.constant 6.400000e+01 : f32
      %256 = vector.broadcast %cst_98 : f32 to vector<2x8x1xf32>
      %257 = arith.divf %255, %256 : vector<2x8x1xf32>
      %258 = vector.broadcast %257 : vector<2x8x1xf32> to vector<2x8x64xf32>
      %259 = arith.subf %245, %258 : vector<2x8x64xf32>
      %260 = arith.mulf %259, %259 : vector<2x8x64xf32>
      %cst_99 = arith.constant dense<0.000000e+00> : vector<2x8xf32>
      %261 = vector.multi_reduction <add>, %260, %cst_99 [2] : vector<2x8x64xf32> to vector<2x8xf32>
      %262 = vector.shape_cast %261 : vector<2x8xf32> to vector<2x8x1xf32>
      %cst_100 = arith.constant 6.400000e+01 : f32
      %263 = vector.broadcast %cst_100 : f32 to vector<2x8x1xf32>
      %264 = arith.divf %262, %263 : vector<2x8x1xf32>
      %265 = vector.broadcast %257 : vector<2x8x1xf32> to vector<2x8x64xf32>
      %266 = arith.subf %245, %265 : vector<2x8x64xf32>
      %cst_101 = arith.constant 9.99999974E-6 : f32
      %267 = vector.broadcast %cst_101 : f32 to vector<2x8x1xf32>
      %268 = arith.addf %264, %267 : vector<2x8x1xf32>
      %269 = math.rsqrt %268 : vector<2x8x1xf32>
      %270 = vector.broadcast %269 : vector<2x8x1xf32> to vector<2x8x64xf32>
      %271 = arith.mulf %266, %270 : vector<2x8x64xf32>
      %272 = vector.shape_cast %252 : vector<1x64xf32> to vector<1x1x64xf32>
      %273 = vector.broadcast %272 : vector<1x1x64xf32> to vector<2x8x64xf32>
      %274 = arith.mulf %271, %273 : vector<2x8x64xf32>
      %275 = vector.shape_cast %253 : vector<1x64xf32> to vector<1x1x64xf32>
      %276 = vector.broadcast %275 : vector<1x1x64xf32> to vector<2x8x64xf32>
      %277 = arith.addf %274, %276 : vector<2x8x64xf32>
      %c0_102 = arith.constant 0 : index
      %c0_103 = arith.constant 0 : index
      %c0_104 = arith.constant 0 : index
      %278 = vector.load %arg20[%c0_102, %c0_103, %c0_104] : memref<2x8x64xf32, #tpu.memory_space<vmem>>, vector<2x8x64xf32>
      tpu.vector_store %arg20[%c0_102, %c0_103, %c0_104], %277 {strides = array<i32>} : memref<2x8x64xf32, #tpu.memory_space<vmem>>, vector<2x8x64xf32>,
    } else {
    }
    %c1_i32_91 = arith.constant 1 : i32
    %249 = arith.cmpi slt, %arg0, %c1_i32_91 : i32
    %250 = arith.extui %249 : i1 to i32
    %c0_i32_92 = arith.constant 0 : i32
    %251 = arith.cmpi ne, %250, %c0_i32_92 : i32
    scf.if %251 {
      %c0_93 = arith.constant 0 : index
      %c0_94 = arith.constant 0 : index
      %c0_95 = arith.constant 0 : index
      %252 = vector.load %arg20[%c0_93, %c0_94, %c0_95] : memref<2x8x64xf32, #tpu.memory_space<vmem>>, vector<2x8x64xf32>
      tpu.vector_store %arg20[%c0_93, %c0_94, %c0_95], %245 {strides = array<i32>} : memref<2x8x64xf32, #tpu.memory_space<vmem>>, vector<2x8x64xf32>,
    } else {
    }
    return
  }
  func.func @transform_1(%arg0: i32) -> (i32, i32) {
    %c0_i32 = arith.constant 0 : i32
    %c0_i32_0 = arith.constant 0 : i32
    %c0_i32_1 = arith.constant 0 : i32
    return %c0_i32, %c0_i32_0 : i32, i32
  }
  func.func @transform_2(%arg0: i32) -> (i32, i32) {
    %c0_i32 = arith.constant 0 : i32
    %c0_i32_0 = arith.constant 0 : i32
    %c0_i32_1 = arith.constant 0 : i32
    return %c0_i32, %c0_i32_0 : i32, i32
  }
  func.func @transform_3(%arg0: i32) -> (i32, i32, i32) {
    %c0_i32 = arith.constant 0 : i32
    %c0_i32_0 = arith.constant 0 : i32
    %c0_i32_1 = arith.constant 0 : i32
    return %arg0, %c0_i32, %c0_i32_0 : i32, i32, i32
  }
  func.func @transform_4(%arg0: i32) -> (i32, i32, i32) {
    %c0_i32 = arith.constant 0 : i32
    %c0_i32_0 = arith.constant 0 : i32
    %c0_i32_1 = arith.constant 0 : i32
    return %arg0, %c0_i32, %c0_i32_0 : i32, i32, i32
  }
  func.func @transform_5(%arg0: i32) -> (i32, i32, i32) {
    %c0_i32 = arith.constant 0 : i32
    %c0_i32_0 = arith.constant 0 : i32
    %c0_i32_1 = arith.constant 0 : i32
    return %arg0, %c0_i32, %c0_i32_0 : i32, i32, i32
  }
  func.func @transform_6(%arg0: i32) -> (i32, i32, i32) {
    %c0_i32 = arith.constant 0 : i32
    %c0_i32_0 = arith.constant 0 : i32
    %c0_i32_1 = arith.constant 0 : i32
    return %arg0, %c0_i32, %c0_i32_0 : i32, i32, i32
  }
  func.func @transform_7(%arg0: i32) -> (i32, i32, i32) {
    %c0_i32 = arith.constant 0 : i32
    %c0_i32_0 = arith.constant 0 : i32
    %c0_i32_1 = arith.constant 0 : i32
    return %arg0, %c0_i32, %c0_i32_0 : i32, i32, i32
  }
  func.func @transform_8(%arg0: i32) -> (i32, i32, i32) {
    %c0_i32 = arith.constant 0 : i32
    %c0_i32_0 = arith.constant 0 : i32
    %c0_i32_1 = arith.constant 0 : i32
    return %arg0, %c0_i32, %c0_i32_0 : i32, i32, i32
  }
  func.func @transform_9(%arg0: i32) -> (i32, i32, i32) {
    %c0_i32 = arith.constant 0 : i32
    %c0_i32_0 = arith.constant 0 : i32
    %c0_i32_1 = arith.constant 0 : i32
    return %arg0, %c0_i32, %c0_i32_0 : i32, i32, i32
  }
  func.func @transform_10(%arg0: i32) -> (i32, i32, i32) {
    %c0_i32 = arith.constant 0 : i32
    %c0_i32_0 = arith.constant 0 : i32
    %c0_i32_1 = arith.constant 0 : i32
    return %arg0, %c0_i32, %c0_i32_0 : i32, i32, i32
  }
  func.func @transform_11(%arg0: i32) -> (i32, i32, i32) {
    %c0_i32 = arith.constant 0 : i32
    %c0_i32_0 = arith.constant 0 : i32
    %c0_i32_1 = arith.constant 0 : i32
    return %arg0, %c0_i32, %c0_i32_0 : i32, i32, i32
  }
  func.func @transform_12(%arg0: i32) -> (i32, i32, i32) {
    %c0_i32 = arith.constant 0 : i32
    %c0_i32_0 = arith.constant 0 : i32
    %c0_i32_1 = arith.constant 0 : i32
    return %arg0, %c0_i32, %c0_i32_0 : i32, i32, i32
  }
  func.func @transform_13(%arg0: i32) -> (i32, i32, i32) {
    %c0_i32 = arith.constant 0 : i32
    %c0_i32_0 = arith.constant 0 : i32
    %c0_i32_1 = arith.constant 0 : i32
    return %arg0, %c0_i32, %c0_i32_0 : i32, i32, i32
  }
  func.func @transform_14(%arg0: i32) -> (i32, i32, i32) {
    %c0_i32 = arith.constant 0 : i32
    %c0_i32_0 = arith.constant 0 : i32
    %c0_i32_1 = arith.constant 0 : i32
    return %arg0, %c0_i32, %c0_i32_0 : i32, i32, i32
  }
  func.func @transform_15(%arg0: i32) -> (i32, i32, i32) {
    %c0_i32 = arith.constant 0 : i32
    %c0_i32_0 = arith.constant 0 : i32
    %c0_i32_1 = arith.constant 0 : i32
    return %arg0, %c0_i32, %c0_i32_0 : i32, i32, i32
  }
  func.func @transform_16(%arg0: i32) -> (i32, i32, i32) {
    %c0_i32 = arith.constant 0 : i32
    %c0_i32_0 = arith.constant 0 : i32
    %c0_i32_1 = arith.constant 0 : i32
    return %arg0, %c0_i32, %c0_i32_0 : i32, i32, i32
  }
  func.func @transform_17(%arg0: i32) -> (i32, i32, i32) {
    %c0_i32 = arith.constant 0 : i32
    %c0_i32_0 = arith.constant 0 : i32
    %c0_i32_1 = arith.constant 0 : i32
    return %arg0, %c0_i32, %c0_i32_0 : i32, i32, i32
  }
  func.func @transform_18(%arg0: i32) -> (i32, i32, i32) {
    %c0_i32 = arith.constant 0 : i32
    %c0_i32_0 = arith.constant 0 : i32
    %c0_i32_1 = arith.constant 0 : i32
    return %arg0, %c0_i32, %c0_i32_0 : i32, i32, i32
  }
  func.func @transform_19(%arg0: i32) -> (i32, i32, i32) {
    %c0_i32 = arith.constant 0 : i32
    %c0_i32_0 = arith.constant 0 : i32
    %c0_i32_1 = arith.constant 0 : i32
    %c0_i32_2 = arith.constant 0 : i32
    return %c0_i32, %c0_i32_0, %c0_i32_1 : i32, i32, i32
  }
}

</mosaic_0001>

<bundles_post_ra>
// kernel: tpu_custom_call.1
= control target key start
LH: loop header
LB: loop body
LE: loop exit
PB: predicated region body
PF: predicated region fallthrough
CT: control target
= control target key end

     0   :  { %s3629_s0 = inlined_call_operand.vmem [shape: f32[2,8,64], index: 0, kind: input, shape index: {}]   ;;  %s3630_s1 = inlined_call_operand.hbm [shape: f32[1,64], index: 1, kind: input, shape index: {}]   ;;  %s3631_s2 = inlined_call_operand.hbm [shape: f32[1,64], index: 2, kind: input, shape index: {}]   ;;  %s3632_s3 = inlined_call_operand.vmem [shape: f32[2,1,64], index: 3, kind: input, shape index: {}]   ;;  %s3633_s4 = inlined_call_operand.vmem [shape: f32[2,1,64], index: 4, kind: input, shape index: {}]   ;;  %s3634_s5 = inlined_call_operand.vmem [shape: s8[2,64,192], index: 5, kind: input, shape index: {}]   ;;  %s3635_s6 = inlined_call_operand.vmem [shape: f32[2,1,192], index: 6, kind: input, shape index: {}]   ;;  %s3636_s7 = inlined_call_operand.vmem [shape: f32[2,1,192], index: 7, kind: input, shape index: {}]   ;;  %s3637_s8 = inlined_call_operand.vmem [shape: s8[2,64,64], index: 8, kind: input, shape index: {}]   ;;  %s3638_s9 = inlined_call_operand.vmem [shape: f32[2,1,64], index: 9, kind: input, shape index: {}]   ;;  %s3639_s10 = inlined_call_operand.vmem [shape: f32[2,1,64], index: 10, kind: input, shape index: {}]   ;;  %s3640_s11 = inlined_call_operand.vmem [shape: f32[2,1,64], index: 11, kind: input, shape index: {}]   ;;  %s3641_s12 = inlined_call_operand.vmem [shape: f32[2,1,64], index: 12, kind: input, shape index: {}]   ;;  %s3642_s13 = inlined_call_operand.vmem [shape: s8[2,64,256], index: 13, kind: input, shape index: {}]   ;;  %s3643_s14 = inlined_call_operand.vmem [shape: f32[2,1,256], index: 14, kind: input, shape index: {}]   ;;  %s3644_s15 = inlined_call_operand.vmem [shape: f32[2,1,256], index: 15, kind: input, shape index: {}]   ;;  %s3645_s16 = inlined_call_operand.vmem [shape: s8[2,256,64], index: 16, kind: input, shape index: {}]   ;;  %s3646_s17 = inlined_call_operand.vmem [shape: f32[2,1,64], index: 17, kind: input, shape index: {}]   ;;  %s3647_s18 = inlined_call_operand.vmem [shape: f32[2,1,64], index: 18, kind: input, shape index: {}]   ;;  %s3648_s19 = inlined_call_operand.hbm [shape: f32[2,8,64], index: 19, kind: output, shape index: {}]  }
   0x1   :  { %3655 = sst [smem:[#allocation17_spill]] %s3629_s0 }
   0x2   :  { %3656 = sst [smem:[#allocation18_spill]] %s3630_s1 }
   0x3   :  { %3657 = sst [smem:[#allocation19_spill]] %s3631_s2 }
   0x4   :  { %3658 = sst [smem:[#allocation20_spill]] %s3632_s3 }
   0x5   :  { %3659 = sst [smem:[#allocation21_spill]] %s3633_s4 }
   0x6   :  { %3660 = sst [smem:[#allocation22_spill]] %s3634_s5 }
   0x7   :  { %3661 = sst [smem:[#allocation23_spill]] %s3636_s7 }
   0x8   :  { %3662 = sst [smem:[#allocation24_spill]] %s3637_s8 }
   0x9   :  { %3663 = sst [smem:[#allocation25_spill]] %s3647_s18 }
   0xa   :  { %3664 = sst [smem:[#allocation26_spill]] %s3648_s19 }
   0xb   :  { %24 = vsyncpa [#allocation4], 0 }
   0xc   :  { %25 = vsyncpa [#allocation7], 0 }
   0xd   :  { %26 = vsyncpa [#allocation5], 0  ;;  %s3156_s0 = smov 0  }
   0xe LB: > { %3665 = sst [smem:[#allocation14_spill]] %s3039_s0  ;;  %s3162_s30 = sadd.s32 4294967295, %s3039_s0   ;;  %s3039_s0 = sphi %s3156_s0, %s32_s0  }
   0xf   : > { %3666 = sst [smem:[#allocation15_spill]] %s3162_s30  ;;  %p2595_p0 = scmp.ge.s32.totalorder %s3039_s0, 1 }
  0x10   : > { %p516_p1 = scmp.lt.s32.totalorder %s3039_s0, 3  ;;  %p3650_p3 = scmp.eq.s32.totalorder %s3162_s30, 0 }
  0x11   : > { %s3041_s21 = smov [#allocation3]   ;;  %s3042_s22 = smov [#allocation6]  }
  0x12   : > { %p3168_p4 = pnand %p2595_p0, %p516_p1  ;;  %s529_s1 = sshll.u32 %s3041_s21, 4  ;;  %s530_s1 = int_to_ptr.vmem [resolvable:$true] %s529_s1 }
  0x13   : > { %s540_s2 = sshll.u32 %s3042_s22, 4  ;;  %s2954_s24 = scalar_lea.vmem %s530_s1, 16  ;;  %s541_s2 = int_to_ptr.vmem [resolvable:$true] %s540_s2 }
  0x14   : > { %p2840_p5 = pneg %p3168_p4  ;;  %p2955_p8 = scmp.ne.s32.totalorder %s530_s1, %s2954_s24 }
  0x15   : > { %s2961_s25 = scalar_lea.vmem %s530_s1, 32  ;;  %p2962_p11 = scmp.lt.s32.totalorder %s530_s1, %s530_s1 }
  0x16   : > { %p3176_p6 = pnand %p3650_p3, %p2840_p5  ;;  %p2963_p12 = scmp.lt.s32.totalorder %s2961_s25, %s2954_s24 }
  0x18   : > { %p2945_p7 = pneg %p3176_p6  ;;  %p2964_p13 = por %p2963_p12, %p2962_p11 }
  0x1a   : > { %p2957_p9 = pnand %p2955_p8, %p2945_p7 }
  0x1c   : > { %p2958_p10 = pneg %p2957_p9 }
  0x1e   : > { %p2965_p0 = pnand %p2964_p13, %p2958_p10 }
  0x20   : > { %2968 = shalt.err (!%p2965_p0)
}
  0x21   : > { %s3669_s27 = sld [smem:[#allocation18_spill]]  ;;  %s2980_s28 = scalar_lea.vmem %s541_s2, 16 }
  0x22   : > { %p2981_p1 = scmp.ne.s32.totalorder %s541_s2, %s2980_s28  ;;  %s2987_s29 = scalar_lea.vmem %s541_s2, 32 }
  0x23   : > { %p2988_p9 = scmp.lt.s32.totalorder %s541_s2, %s541_s2  ;;  %p2989_p2 = scmp.lt.s32.totalorder %s2987_s29, %s2980_s28 }
  0x24   : > { %p2983_p5 = pnand %p2981_p1, %p2945_p7 }
  0x25   : > { %p2990_p3 = por %p2989_p2, %p2988_p9 }
  0x26   : > { %p2984_p8 = pneg %p2983_p5 }
  0x27   : > { %2843 = dma.hbm_to_vmem [thread:$0]  (!%p3176_p6), %s3669_s27, 16, %s530_s1, [#allocation4]  }
  0x28   : > { %p2991_p11 = pnand %p2990_p3, %p2984_p8 }
  0x2a   : > { %2994 = shalt.err (!%p2991_p11)
}
  0x2b   : > { %s3670_s24 = sld [smem:[#allocation19_spill]] }
  0x2d   : > { %661 = sbr.rel (%p3168_p4) target bundleno = 4412 (0x113c), region = 92 }
  0x31   : > { %2846 = dma.hbm_to_vmem [thread:$0]  (!%p3176_p6), %s3670_s24, 16, %s541_s2, [#allocation7]  }
  0x32   : > { %p3671_p10 = scmp.eq.s32.totalorder %s3162_s30, 0 }
  0x34   : > { %3024 = dma.done.wait (%p3671_p10), [#allocation4], 16   ;;  %p3672_p7 = pmov %p3671_p10 }
  0x36   : > { %3026 = vsyncadd (%p3672_p7), [#allocation4], 4294967280  ;;  %p3673_p12 = pmov %p3672_p7 }
  0x37   : > { %p3674_p2 = pmov %p3672_p7 }
  0x38   : > { %3028 = dma.done.wait (%p3673_p12), [#allocation7], 16  }
  0x39   : > { %3030 = vsyncadd (%p3674_p2), [#allocation7], 4294967280  ;;  %p769_p3 = scmp.lt.s32.totalorder %s3162_s30, 1  ;;  %s3677_s5 = sld [smem:[#allocation22_spill]] }
  0x3a   : > { %s3680_s8 = sld [smem:[#allocation24_spill]] }
  0x3b   : > { %s3210_s1 = scalar_select %p769_p3, %s3162_s30, 1 }
  0x3c   : > { %s3681_s19 = sld [smem:[#allocation25_spill]] }
  0x3d   : > { %s2654_s28 = sshll.u32 %s3210_s1, 5  ;;  %s3222_s29 = sshll.u32 %s3210_s1, 1 }
  0x3e   : > { %s2655_s25 = sshll.u32 %s3210_s1, 4  ;;  %s3262_s0 = scalar_lea.vmem %s3642_s13, %s2654_s28 }
  0x3f   : > { %s3227_s24 = scalar_lea.vmem %s3677_s5, %s2654_s28  ;;  %s2657_s18 = sshll.u32 %s3210_s1, 6 }
  0x40   : > { %3678 = sst [smem:[#allocation16_spill]] %s3227_s24  ;;  %s3241_s21 = scalar_lea.vmem %s3680_s8, %s2655_s25 }
  0x41   : > { %s825_s23 = scalar_lea.vmem %s3646_s17, %s3210_s1  ;;  %s3280_s27 = scalar_lea.vmem %s3645_s16, %s2657_s18 }
  0x42   : > { %s828_s8 = scalar_lea.vmem %s3681_s19, %s3210_s1  ;;  %s3682_s25 = sld [smem:[#allocation15_spill]] }
  0x48   : > { %p3683_p4 = scmp.ne.s32.totalorder %s3682_s25, 0 }
  0x49   : > { %s3684_s5 = sld [smem:[#allocation17_spill]] (!%p3683_p4) }
  0x4a   : > { %833 = sbr.rel (%p3683_p4) target bundleno = 84 (0x54), region = 104 }
  0x4f   : > { %v867_v0 = vld [vmem:[%s3684_s5] sm:$0xff]  ;;  %v869_v1 = vld [vmem:[%s3684_s5 + $0x8] sm:$0xff] }
  0x50   : > { %868 = vst [vmem:[#allocation8] sm:$0xff] %v867_v0  ;;  %870 = vst [vmem:[#allocation8 + $0x8] sm:$0xff] %v869_v1 }
  0x51   : > { %878 = vsyncadd [#allocation2], 256 }
  0x52   : > { %3031 = dma.done.wait [#allocation2], 256 }
  0x53   : > { %3032 = vsyncadd [#allocation2], 4294967040 }
  0x54 PF: > { %vm921_vm0 = vcmask 523264   ;;  %s3685_s18 = sld [smem:[#allocation16_spill]]  ;;  %v3043_v21 = vmov 0   ;;  %v3044_v46 = vmov 0.0   ;;  %v915_v47 = vlaneseq  ;;  %s3690_s4 = scalar_lea.vmem %s3635_s6, %s3222_s29 }
  0x55   : > { %1009 = vmatprep.mubr.bf16.mxu1 %v3043_v21  ;;  %s3686_s20 = sld [smem:[#allocation20_spill]]  ;;  %2732 = vmatprep.subr.bf16.mxu0 %v3044_v46  ;;  %v891_v50 = vld [vmem:[%s3690_s4] sm:$0x3]  ;;  %vm3045_vm1 = vmmov 0   ;;  %vm1185_vm2 = vcmask 1043456   ;;  %vm1061_vm3 = vcmask 130048   ;;  %s3693_s4 = scalar_lea.vmem %s3638_s9, %s3210_s1 }
  0x56   : > { %s3688_s7 = sld [smem:[#allocation21_spill]]  ;;  %v916_v48 = vshrl.u32 %v915_v47, 7  ;;  %2734 = vmatprep.mubr.msk.bf16.mxu0 %vm3045_vm1, %v3044_v46  ;;  %vm1157_vm5 = vcmask 64512   ;;  %s3048_s3 = smov 112   ;;  %vm1965_vm6 = vcmask 261120   ;;  %vm1968_vm7 = vcmask 392192  }
  0x57   : > { %v3294_v2 = vld [vmem:[#allocation8] sm:$0xff]  ;;  %v3296_v3 = vld [vmem:[#allocation8 + $0x8] sm:$0xff]  ;;  %s3691_s22 = sld [smem:[#allocation23_spill]]  ;;  %s3049_s26 = smov 32  }
  0x58   : > { %v922_v4 = vsel %vm921_vm0, %v3294_v2, 0.0  ;;  %v925_v5 = vsel %vm921_vm0, %v3296_v3, 0.0  ;;  %v3324_v49 = vsub.s32 0, %v916_v48  ;;  %v3331_v51 = vsub.s32 1, %v916_v48  ;;  %s3052_s19 = smov 80  }
  0x59   : > { %923 = vadd.xlane.f32.xlu0 %v922_v4 }
  0x5a   : > { %v890_v16 = vld [vmem:[%s3685_s18 + $0x18] sm:$0xff]  ;;  %v889_v17 = vld [vmem:[%s3685_s18 + $0x10] sm:$0xff]  ;;  %v888_v22 = vld [vmem:[%s3685_s18 + $0x8] sm:$0xff]  ;;  %v1024_v53 = vrot.slane %v891_v50, %v3324_v49  ;;  %v1028_v55 = vrot.slane %v891_v50, %v3331_v51 }
  0x5b   : > { %v971_v18 = vunpack.c.l.s8.bf16 %v890_v16  ;;  %v973_v19 = vunpack.c.h.s8.bf16 %v890_v16  ;;  %v972_v20 = vunpack.c.h.s8.bf16 %v889_v17  ;;  %v970_v23 = vunpack.c.l.s8.bf16 %v889_v17  ;;  %v887_v25 = vld [vmem:[%s3685_s18] sm:$0xff]  ;;  %s3687_s2 = scalar_lea.vmem %s3686_s20, %s3210_s1  ;;  %s3046_s20 = smov 64  }
  0x5c   : > { %v969_v24 = vunpack.c.h.s8.bf16 %v888_v22  ;;  %v968_v26 = vunpack.c.h.s8.bf16 %v887_v25  ;;  %v967_v27 = vunpack.c.l.s8.bf16 %v888_v22  ;;  %v966_v28 = vunpack.c.l.s8.bf16 %v887_v25  ;;  %v2615_v37 = vld [vmem:[%s3687_s2] ss:$0 sm:$0xff]  ;;  %s3689_s28 = scalar_lea.vmem %s3688_s7, %s3210_s1  ;;  %s3047_s2 = smov 48  }
  0x5d   : > { %926 = vadd.xlane.f32.xlu0 %v925_v5  ;;  %985 = vmatprep.subr.bf16.mxu1 %v973_v19  ;;  %v2616_v41 = vld [vmem:[%s3689_s28] ss:$0 sm:$0xff]  ;;  %s3692_s24 = scalar_lea.vmem %s3691_s22, %s3222_s29  ;;  %v918_v22 = vand.u32 127, %v915_v47  ;;  %s3050_s7 = smov 96  }
  0x5e   : > { %986 = vmatpush1.bf16.msra.mxu1 %v972_v20  ;;  %v892_v52 = vld [vmem:[%s3692_s24] sm:$0x3]  ;;  %s3051_s28 = smov 16   ;;  %s3694_s22 = scalar_lea.vmem %s3639_s10, %s3210_s1 }
  0x5f   : > { %987 = vmatprep.subr.bf16.mxu1 %v971_v18  ;;  %v1039_v54 = vrot.slane %v892_v52, %v3324_v49  ;;  %v1043_v58 = vrot.slane %v892_v52, %v3331_v51  ;;  %vm919_vm4 = vcmp.gt.s32.totalorder %v918_v22, %v916_v48 }
  0x62   : > { %988 = vmatpush1.bf16.msra.mxu1 %v970_v23  ;;  %v3379_v23 = vsel %vm919_vm4, -1e+30, %v3044_v46 }
  0x63   : > { %989 = vmatprep.subr.bf16.mxu1 %v969_v24 }
  0x66   : > { %990 = vmatpush1.bf16.msra.mxu1 %v968_v26 }
  0x67   : > { %991 = vmatprep.subr.bf16.mxu1 %v967_v27 }
  0x6a   : > { %992 = vmatpush1.bf16.msra.mxu1 %v966_v28 }
  0x6b   : > { %2720 = vmatprep.subr.bf16.mxu1 %v3044_v46 }
  0xe2   : > { %v924_v6 = vpop.xlane.xlu0 %923 }
  0xe3   : > { %v929_v7 = vmul.f32 0.015625, %v924_v6 }
  0xe5   : > { %v931_v8 = vsub.f32 %v3294_v2, %v929_v7 }
  0xe6   : > { %v927_v9 = vpop.xlane.xlu0 %926 }
  0xe7   : > { %v930_v10 = vmul.f32 0.015625, %v927_v9  ;;  %v933_v11 = vmul.f32 %v931_v8, %v931_v8 }
  0xe9   : > { %v932_v12 = vsub.f32 %v3296_v3, %v930_v10  ;;  %v935_v13 = vsel %vm921_vm0, %v933_v11, 0.0 }
  0xea   : > { %936 = vadd.xlane.f32.xlu1 %v935_v13 }
  0xeb   : > { %v934_v14 = vmul.f32 %v932_v12, %v932_v12 }
  0xed   : > { %v938_v15 = vsel %vm921_vm0, %v934_v14, 0.0 }
  0xee   : > { %939 = vadd.xlane.f32.xlu1 %v938_v15 }
 0x173   : > { %v937_v29 = vpop.xlane.xlu1 %936 }
 0x174   : > { %v941_v30 = vmul.f32 0.015625, %v937_v29 }
 0x176   : > { %v943_v31 = vadd.f32 1e-05, %v941_v30 }
 0x177   : > { %v940_v32 = vpop.xlane.xlu1 %939 }
 0x178   : > { %2891 = vrsqrt.f32 %v943_v31  ;;  %v942_v33 = vmul.f32 0.015625, %v940_v32 }
 0x17a   : > { %v944_v34 = vadd.f32 1e-05, %v942_v33 }
 0x17c   : > { %2893 = vrsqrt.f32 %v944_v34 }
 0x185   : > { %v2892_v35 = vpop.eup %2891 }
 0x186   : > { %v947_v36 = vmul.f32 %v2892_v35, %v931_v8 }
 0x188   : > { %v955_v40 = vmul.f32 %v2615_v37, %v947_v36 }
 0x189   : > { %v2894_v38 = vpop.eup %2893 }
 0x18a   : > { %v948_v39 = vmul.f32 %v2894_v38, %v932_v12  ;;  %v963_v43 = vadd.f32 %v2616_v41, %v955_v40 }
 0x18c   : > { %v956_v42 = vmul.f32 %v2615_v37, %v948_v39 }
 0x18e   : > { %v964_v44 = vadd.f32 %v2616_v41, %v956_v42 }
 0x190   : > { %v965_v45 = vpack.c.bf16 %v964_v44, %v963_v43 }
 0x192   : > { %2617 = vmatmul.mubr.msk.bf16.vlgmr.msra.gmra.mxu1 %vm921_vm0, %v965_v45 }
 0x193   : > { %2722 = vmatprep.mubr.msk.bf16.mxu1 %vm3045_vm1, %v3044_v46 }
 0x252   : > { %v1011_v56 = vpop.f32.mrf.mxu1 }
 0x253   : > { %v1031_v57 = vmul.f32 %v1024_v53, %v1011_v56 }
 0x254   : > { %v1013_v59 = vpop.f32.mrf.mxu1 }
 0x255   : > { %v1046_v60 = vadd.f32 %v1039_v54, %v1031_v57  ;;  %v1032_v61 = vmul.f32 %v1028_v55, %v1013_v59 }
 0x256   : > { %v1015_v62 = vpop.f32.mrf.mxu1 }
 0x257   : > { %v3346_v63 = vpack.c.bf16 %v1046_v60, %v1046_v60  ;;  %v1047_v0 = vadd.f32 %v1043_v58, %v1032_v61  ;;  %v1033_v1 = vmul.f32 %v1024_v53, %v1015_v62  ;;  %v1050_v13 = vmul.f32 0.25, %v1046_v60 }
 0x258   : > { %v1017_v4 = vpop.f32.mrf.mxu1 }
 0x259   : > { %v3348_v5 = vpack.c.bf16 %v1047_v0, %v1047_v0  ;;  %v1048_v6 = vadd.f32 %v1039_v54, %v1033_v1  ;;  %v1034_v7 = vmul.f32 %v1028_v55, %v1017_v4  ;;  %1059 = vrot.lane.b32.xlu0 %v3346_v63, %s3046_s20  ;;  %v3359_v15 = vpack.c.bf16 %v1050_v13, %v1050_v13 }
 0x25b   : > { %v3351_v8 = vpack.c.bf16 %v1048_v6, %v1048_v6  ;;  %v1049_v9 = vadd.f32 %v1043_v58, %v1034_v7  ;;  %v1187_v10 = vsel %vm1185_vm2, %v3348_v5, 0  ;;  %v1051_v17 = vmul.f32 0.25, %v1048_v6 }
 0x25c   : > { %2733 = vmatpush3.bf16.msra.mxu0 %v1187_v10 }
 0x25d   : > { %1109 = vrot.lane.b32.xlu1 %v3351_v8, %s3046_s20  ;;  %2744 = vmatprep.subr.bf16.mxu0 %v3044_v46  ;;  %v3367_v18 = vpack.c.bf16 %v1049_v9, %v1049_v9  ;;  %v3369_v19 = vpack.c.bf16 %v1051_v17, %v1051_v17  ;;  %s3695_s20 = scalar_lea.vmem %s3640_s11, %s3210_s1 }
 0x25f   : > { %v1233_v20 = vsel %vm1185_vm2, %v3367_v18, 0 }
 0x2cb   : > { %v1060_v11 = vpop.permute.xlu0 %1059 }
 0x2cc   : > { %v1066_v12 = vsel %vm1061_vm3, %v1060_v11, 0 }
 0x2cd   : > { %2721 = vmatpush3.bf16.xpose.msra.mxu1 %v1066_v12 }
 0x2ce   : > { %2726 = vmatprep.subr.bf16.mxu1 %v3044_v46 }
 0x2cf   : > { %v1110_v14 = vpop.permute.xlu1 %1109 }
 0x2d0   : > { %v1115_v16 = vsel %vm1061_vm3, %v1110_v14, 0 }
 0x2d4   : > { %2723 = vmatmul.mubr.msk.bf16.vlgmr.msra.gmra.mxu1 %vm1061_vm3, %v3359_v15 }
 0x2d5   : > { %2727 = vmatpush3.bf16.xpose.msra.mxu1 %v1115_v16  ;;  %2728 = vmatprep.mubr.msk.bf16.mxu1 %vm3045_vm1, %v3044_v46 }
 0x2d6   : > { %2738 = vmatprep.subr.bf16.mxu1 %v3044_v46 }
 0x2dc   : > { %2729 = vmatmul.mubr.msk.bf16.vlgmr.msra.gmra.mxu1 %vm1061_vm3, %v3369_v19 }
 0x2dd   : > { %2739 = vmatpush3.bf16.msra.mxu1 %v1233_v20  ;;  %2740 = vmatprep.mubr.msk.bf16.mxu1 %vm3045_vm1, %v3044_v46 }
 0x2de   : > { %2750 = vmatprep.subr.bf16.mxu1 %v3044_v46 }
 0x394   : > { %v1102_v24 = vpop.f32.mrf.mxu1 }
 0x395   : > { %v1103_v25 = vadd.f32 %v1102_v24, %v3379_v23 }
 0x396   : > { %v2724_v26 = vpop.f32.mrf.mxu1 }
 0x397   : > { %v1158_v27 = vsel %vm1157_vm5, %v1103_v25, -inf }
 0x398   : > { %1159 = vmax.xlane.f32.xlu1 %v1158_v27  ;;  %v1105_v28 = vpop.f32.mrf.mxu1 }
 0x39a   : > { %v2725_v29 = vpop.f32.mrf.mxu1 }
 0x39c   : > { %v1151_v30 = vpop.f32.mrf.mxu1 }
 0x39d   : > { %v1152_v31 = vadd.f32 %v1151_v30, %v3379_v23 }
 0x39e   : > { %v2730_v32 = vpop.f32.mrf.mxu1 }
 0x39f   : > { %v1161_v33 = vsel %vm1157_vm5, %v1152_v31, -inf }
 0x3a0   : > { %1162 = vmax.xlane.f32.xlu0 %v1161_v33  ;;  %v1154_v34 = vpop.f32.mrf.mxu1 }
 0x3a2   : > { %v2731_v35 = vpop.f32.mrf.mxu1 }
 0x3a9   : > { %1329 = vrot.lane.b32.xlu1 %v3351_v8, %s3047_s2 }
 0x421   : > { %v1160_v36 = vpop.xlane.xlu1 %1159 }
 0x422   : > { %v1164_v37 = vsub.f32 %v1103_v25, %v1160_v36 }
 0x424   : > { %v1166_v38 = vmul.f32 1.442695, %v1164_v37 }
 0x425   : > { %v1330_v48 = vpop.permute.xlu1 %1329 }
 0x426   : > { %2895 = vpow2.f32 %v1166_v38  ;;  %v1335_v61 = vsel %vm1061_vm3, %v1330_v48, 0 }
 0x429   : > { %v1163_v39 = vpop.xlane.xlu0 %1162 }
 0x42a   : > { %v1165_v40 = vsub.f32 %v1152_v31, %v1163_v39 }
 0x42c   : > { %v1168_v41 = vmul.f32 1.442695, %v1165_v40 }
 0x42e   : > { %2897 = vpow2.f32 %v1168_v41 }
 0x433   : > { %v2896_v42 = vpop.eup %2895 }
 0x434   : > { %v1170_v43 = vsel %vm1157_vm5, %v2896_v42, 0.0 }
 0x435   : > { %1171 = vadd.xlane.f32.xlu0 %v1170_v43 }
 0x43b   : > { %v2898_v44 = vpop.eup %2897 }
 0x43c   : > { %v1173_v45 = vsel %vm1157_vm5, %v2898_v44, 0.0 }
 0x43d   : > { %1174 = vadd.xlane.f32.xlu1 %v1173_v45 }
 0x44b   : > { %1278 = vrot.lane.b32.xlu0 %v3346_v63, %s3047_s2 }
 0x44e   : > { %1276 = vrot.lane.b32.xlu1 %v3359_v15, %s3048_s3 }
 0x452   : > { %1327 = vrot.lane.b32.xlu1 %v3369_v19, %s3048_s3 }
 0x4be   : > { %v1172_v47 = vpop.xlane.xlu0 %1171 }
 0x4bf   : > { %2899 = vrcp.f32 %v1172_v47 }
 0x4c2   : > { %v1279_v54 = vpop.permute.xlu0 %1278 }
 0x4c3   : > { %v1284_v56 = vsel %vm1061_vm3, %v1279_v54, 0 }
 0x4c6   : > { %v1175_v50 = vpop.xlane.xlu1 %1174 }
 0x4c7   : > { %2901 = vrcp.f32 %v1175_v50 }
 0x4ca   : > { %v1277_v60 = vpop.permute.xlu1 %1276 }
 0x4cc   : > { %v2900_v52 = vpop.eup %2899 }
 0x4cd   : > { %v1178_v53 = vmul.f32 %v2900_v52, %v2896_v42 }
 0x4ce   : > { %v1328_v62 = vpop.permute.xlu1 %1327 }
 0x4cf   : > { %v1180_v55 = vpack.c.bf16 %v1178_v53, %v1178_v53 }
 0x4d1   : > { %2735 = vmatmul.mubr.msk.bf16.vlgmr.msra.gmra.mxu0 %vm1157_vm5, %v1180_v55 }
 0x4d2   : > { %2745 = vmatpush3.bf16.xpose.msra.mxu0 %v1284_v56  ;;  %2746 = vmatprep.mubr.msk.bf16.mxu0 %vm3045_vm1, %v3044_v46 }
 0x4d3   : > { %2756 = vmatprep.subr.bf16.mxu0 %v3044_v46 }
 0x4d4   : > { %v2902_v57 = vpop.eup %2901 }
 0x4d5   : > { %v1179_v58 = vmul.f32 %v2902_v57, %v2898_v44 }
 0x4d7   : > { %v1181_v59 = vpack.c.bf16 %v1179_v58, %v1179_v58 }
 0x4d9   : > { %2741 = vmatmul.mubr.msk.bf16.vlgmr.msra.gmra.mxu1 %vm1157_vm5, %v1181_v59  ;;  %2747 = vmatmul.mubr.msk.bf16.vlgmr.msra.gmra.mxu0 %vm1061_vm3, %v1277_v60 }
 0x4da   : > { %2751 = vmatpush3.bf16.xpose.msra.mxu1 %v1335_v61  ;;  %2752 = vmatprep.mubr.msk.bf16.mxu1 %vm3045_vm1, %v3044_v46 }
 0x4db   : > { %2762 = vmatprep.subr.bf16.mxu1 %v3044_v46  ;;  %2758 = vmatprep.mubr.msk.bf16.mxu0 %vm3045_vm1, %v3044_v46 }
 0x4e1   : > { %2753 = vmatmul.mubr.msk.bf16.vlgmr.msra.gmra.mxu1 %vm1061_vm3, %v1328_v62 }
 0x4e2   : > { %2764 = vmatprep.mubr.msk.bf16.mxu1 %vm3045_vm1, %v3044_v46 }
 0x591   : > { %v3411_v0 = vpop.f32.mrf.mxu0 }
 0x593   : > { %v2736_v1 = vpop.f32.mrf.mxu0 }
 0x595   : > { %v1226_v4 = vpop.f32.mrf.mxu0 }
 0x597   : > { %v2737_v6 = vpop.f32.mrf.mxu0 }
 0x599   : > { %v3413_v7 = vpop.f32.mrf.mxu1  ;;  %v1320_v9 = vpop.f32.mrf.mxu0 }
 0x59a   : > { %v1321_v10 = vadd.f32 %v1320_v9, %v3379_v23 }
 0x59b   : > { %v2742_v11 = vpop.f32.mrf.mxu1  ;;  %v2748_v12 = vpop.f32.mrf.mxu0 }
 0x59c   : > { %v1377_v13 = vsel %vm1157_vm5, %v1321_v10, -inf }
 0x59d   : > { %1378 = vmax.xlane.f32.xlu0 %v1377_v13  ;;  %v1272_v14 = vpop.f32.mrf.mxu1  ;;  %v1323_v16 = vpop.f32.mrf.mxu0 }
 0x59f   : > { %v2743_v17 = vpop.f32.mrf.mxu1  ;;  %v2749_v20 = vpop.f32.mrf.mxu0 }
 0x5a1   : > { %v1371_v22 = vpop.f32.mrf.mxu1 }
 0x5a2   : > { %v1372_v24 = vadd.f32 %v1371_v22, %v3379_v23 }
 0x5a3   : > { %v2754_v25 = vpop.f32.mrf.mxu1 }
 0x5a4   : > { %v1380_v26 = vsel %vm1157_vm5, %v1372_v24, -inf }
 0x5a5   : > { %1381 = vmax.xlane.f32.xlu1 %v1380_v26  ;;  %v1374_v27 = vpop.f32.mrf.mxu1 }
 0x5a7   : > { %v2755_v28 = vpop.f32.mrf.mxu1 }
 0x5b6   : > { %1451 = vrot.lane.b32.xlu1 %v3367_v18, %s3048_s3 }
 0x5ba   : > { %1501 = vrot.lane.b32.xlu1 %v3346_v63, %s3049_s26 }
 0x5be   : > { %1551 = vrot.lane.b32.xlu1 %v3351_v8, %s3049_s26 }
 0x5c2   : > { %1549 = vrot.lane.b32.xlu1 %v3369_v19, %s3050_s7 }
 0x626   : > { %v1379_v29 = vpop.xlane.xlu0 %1378 }
 0x627   : > { %v1383_v30 = vsub.f32 %v1321_v10, %v1379_v29 }
 0x629   : > { %v1385_v31 = vmul.f32 1.442695, %v1383_v30 }
 0x62b   : > { %2903 = vpow2.f32 %v1385_v31 }
 0x62e   : > { %v1382_v32 = vpop.xlane.xlu1 %1381 }
 0x62f   : > { %v1384_v33 = vsub.f32 %v1372_v24, %v1382_v32 }
 0x631   : > { %v1387_v34 = vmul.f32 1.442695, %v1384_v33 }
 0x632   : > { %v1452_v35 = vpop.permute.xlu1 %1451 }
 0x633   : > { %2905 = vpow2.f32 %v1387_v34  ;;  %v1457_v36 = vsel %vm1185_vm2, %v1452_v35, 0 }
 0x634   : > { %2763 = vmatpush3.bf16.msra.mxu1 %v1457_v36 }
 0x635   : > { %2774 = vmatprep.subr.bf16.mxu1 %v3044_v46 }
 0x636   : > { %v1502_v48 = vpop.permute.xlu1 %1501 }
 0x637   : > { %v1507_v52 = vsel %vm1061_vm3, %v1502_v48, 0 }
 0x638   : > { %v2904_v37 = vpop.eup %2903 }
 0x639   : > { %v1389_v38 = vsel %vm1157_vm5, %v2904_v37, 0.0 }
 0x63a   : > { %1390 = vadd.xlane.f32.xlu0 %v1389_v38  ;;  %v1552_v55 = vpop.permute.xlu1 %1551 }
 0x63b   : > { %v1557_v58 = vsel %vm1061_vm3, %v1552_v55, 0 }
 0x63e   : > { %v1550_v59 = vpop.permute.xlu1 %1549 }
 0x640   : > { %v2906_v39 = vpop.eup %2905 }
 0x641   : > { %v1392_v40 = vsel %vm1157_vm5, %v2906_v39, 0.0 }
 0x642   : > { %1393 = vadd.xlane.f32.xlu0 %v1392_v40 }
 0x658   : > { %1402 = vrot.lane.b32.xlu0 %v3348_v5, %s3048_s3 }
 0x65c   : > { %1499 = vrot.lane.b32.xlu0 %v3359_v15, %s3050_s7 }
 0x6c3   : > { %v1391_v41 = vpop.xlane.xlu0 %1390 }
 0x6c4   : > { %2907 = vrcp.f32 %v1391_v41 }
 0x6cb   : > { %v1394_v42 = vpop.xlane.xlu0 %1393 }
 0x6cc   : > { %2909 = vrcp.f32 %v1394_v42 }
 0x6cf   : > { %v1403_v43 = vpop.permute.xlu0 %1402 }
 0x6d0   : > { %v1408_v44 = vsel %vm1185_vm2, %v1403_v43, 0 }
 0x6d1   : > { %v2908_v45 = vpop.eup %2907  ;;  %2757 = vmatpush3.bf16.msra.mxu0 %v1408_v44 }
 0x6d2   : > { %2768 = vmatprep.subr.bf16.mxu0 %v3044_v46  ;;  %v1397_v47 = vmul.f32 %v2908_v45, %v2904_v37 }
 0x6d3   : > { %v1500_v57 = vpop.permute.xlu0 %1499 }
 0x6d4   : > { %v1399_v50 = vpack.c.bf16 %v1397_v47, %v1397_v47 }
 0x6d6   : > { %2759 = vmatmul.mubr.msk.bf16.vlgmr.msra.gmra.mxu0 %vm1157_vm5, %v1399_v50 }
 0x6d7   : > { %2769 = vmatpush3.bf16.xpose.msra.mxu0 %v1507_v52  ;;  %2770 = vmatprep.mubr.msk.bf16.mxu0 %vm3045_vm1, %v3044_v46 }
 0x6d8   : > { %2780 = vmatprep.subr.bf16.mxu0 %v3044_v46 }
 0x6d9   : > { %v2910_v53 = vpop.eup %2909 }
 0x6da   : > { %v1398_v54 = vmul.f32 %v2910_v53, %v2906_v39 }
 0x6dc   : > { %v1400_v56 = vpack.c.bf16 %v1398_v54, %v1398_v54 }
 0x6de   : > { %2765 = vmatmul.mubr.msk.bf16.vlgmr.msra.gmra.mxu1 %vm1157_vm5, %v1400_v56  ;;  %2771 = vmatmul.mubr.msk.bf16.vlgmr.msra.gmra.mxu0 %vm1061_vm3, %v1500_v57 }
 0x6df   : > { %2775 = vmatpush3.bf16.xpose.msra.mxu1 %v1557_v58  ;;  %2776 = vmatprep.mubr.msk.bf16.mxu1 %vm3045_vm1, %v3044_v46 }
 0x6e0   : > { %2786 = vmatprep.subr.bf16.mxu1 %v3044_v46  ;;  %2782 = vmatprep.mubr.msk.bf16.mxu0 %vm3045_vm1, %v3044_v46 }
 0x6e6   : > { %2777 = vmatmul.mubr.msk.bf16.vlgmr.msra.gmra.mxu1 %vm1061_vm3, %v1550_v59 }
 0x6e7   : > { %2788 = vmatprep.mubr.msk.bf16.mxu1 %vm3045_vm1, %v3044_v46 }
 0x796   : > { %v3453_v60 = vpop.f32.mrf.mxu0 }
 0x798   : > { %v2760_v61 = vpop.f32.mrf.mxu0 }
 0x79a   : > { %v1447_v62 = vpop.f32.mrf.mxu0 }
 0x79c   : > { %v2761_v1 = vpop.f32.mrf.mxu0 }
 0x79e   : > { %v3455_v4 = vpop.f32.mrf.mxu1  ;;  %v1543_v6 = vpop.f32.mrf.mxu0 }
 0x79f   : > { %v2876_v9 = vpack.i.bf16 %v3455_v4, %v3453_v60  ;;  %v1544_v10 = vadd.f32 %v1543_v6, %v3379_v23 }
 0x7a0   : > { %v2766_v11 = vpop.f32.mrf.mxu1  ;;  %v2772_v12 = vpop.f32.mrf.mxu0 }
 0x7a1   : > { %v1599_v13 = vsel %vm1157_vm5, %v1544_v10, -inf }
 0x7a2   : > { %1600 = vmax.xlane.f32.xlu0 %v1599_v13  ;;  %v1496_v14 = vpop.f32.mrf.mxu1  ;;  %v1546_v16 = vpop.f32.mrf.mxu0 }
 0x7a4   : > { %v2767_v17 = vpop.f32.mrf.mxu1  ;;  %v2773_v20 = vpop.f32.mrf.mxu0 }
 0x7a6   : > { %v1593_v22 = vpop.f32.mrf.mxu1 }
 0x7a7   : > { %v1594_v24 = vadd.f32 %v1593_v22, %v3379_v23 }
 0x7a8   : > { %v2778_v25 = vpop.f32.mrf.mxu1 }
 0x7a9   : > { %v1602_v26 = vsel %vm1157_vm5, %v1594_v24, -inf }
 0x7aa   : > { %1603 = vmax.xlane.f32.xlu1 %v1602_v26  ;;  %v1596_v27 = vpop.f32.mrf.mxu1 }
 0x7ac   : > { %v2779_v28 = vpop.f32.mrf.mxu1 }
 0x7bb   : > { %1671 = vrot.lane.b32.xlu1 %v3367_v18, %s3050_s7 }
 0x7bf   : > { %1721 = vrot.lane.b32.xlu1 %v3346_v63, %s3051_s28 }
 0x7c3   : > { %1771 = vrot.lane.b32.xlu1 %v3351_v8, %s3051_s28 }
 0x7c7   : > { %1769 = vrot.lane.b32.xlu1 %v3369_v19, %s3052_s19 }
 0x82b   : > { %v1601_v29 = vpop.xlane.xlu0 %1600 }
 0x82c   : > { %v1605_v30 = vsub.f32 %v1544_v10, %v1601_v29 }
 0x82e   : > { %v1607_v31 = vmul.f32 1.442695, %v1605_v30 }
 0x830   : > { %2911 = vpow2.f32 %v1607_v31 }
 0x833   : > { %v1604_v32 = vpop.xlane.xlu1 %1603 }
 0x834   : > { %v1606_v33 = vsub.f32 %v1594_v24, %v1604_v32 }
 0x836   : > { %v1609_v34 = vmul.f32 1.442695, %v1606_v33 }
 0x837   : > { %v1672_v35 = vpop.permute.xlu1 %1671 }
 0x838   : > { %2913 = vpow2.f32 %v1609_v34  ;;  %v1677_v36 = vsel %vm1185_vm2, %v1672_v35, 0 }
 0x839   : > { %2787 = vmatpush3.bf16.msra.mxu1 %v1677_v36 }
 0x83a   : > { %2798 = vmatprep.subr.bf16.mxu1 %v3044_v46 }
 0x83b   : > { %v1722_v44 = vpop.permute.xlu1 %1721 }
 0x83c   : > { %v1727_v47 = vsel %vm1061_vm3, %v1722_v44, 0  ;;  %v893_v44 = vld [vmem:[%s3241_s21] sm:$0xff] }
 0x83d   : > { %v2912_v63 = vpop.eup %2911 }
 0x83e   : > { %v1611_v8 = vsel %vm1157_vm5, %v2912_v63, 0.0 }
 0x83f   : > { %1612 = vadd.xlane.f32.xlu0 %v1611_v8  ;;  %v1772_v50 = vpop.permute.xlu1 %1771 }
 0x840   : > { %v1777_v54 = vsel %vm1061_vm3, %v1772_v50, 0 }
 0x843   : > { %v1770_v55 = vpop.permute.xlu1 %1769 }
 0x845   : > { %v2914_v37 = vpop.eup %2913 }
 0x846   : > { %v1614_v19 = vsel %vm1157_vm5, %v2914_v37, 0.0 }
 0x847   : > { %1615 = vadd.xlane.f32.xlu0 %v1614_v19 }
 0x85d   : > { %1623 = vrot.lane.b32.xlu0 %v3348_v5, %s3050_s7 }
 0x861   : > { %1719 = vrot.lane.b32.xlu0 %v3359_v15, %s3052_s19 }
 0x8c8   : > { %v1613_v38 = vpop.xlane.xlu0 %1612 }
 0x8c9   : > { %2915 = vrcp.f32 %v1613_v38 }
 0x8d0   : > { %v1616_v39 = vpop.xlane.xlu0 %1615 }
 0x8d1   : > { %2917 = vrcp.f32 %v1616_v39 }
 0x8d4   : > { %v1624_v40 = vpop.permute.xlu0 %1623 }
 0x8d5   : > { %v1629_v41 = vsel %vm1185_vm2, %v1624_v40, 0 }
 0x8d6   : > { %v2916_v42 = vpop.eup %2915  ;;  %2781 = vmatpush3.bf16.msra.mxu0 %v1629_v41  ;;  %v894_v41 = vld [vmem:[%s3241_s21 + $0x8] sm:$0xff] }
 0x8d7   : > { %2792 = vmatprep.subr.bf16.mxu0 %v3044_v46  ;;  %v1619_v43 = vmul.f32 %v2916_v42, %v2912_v63  ;;  %v1976_v42 = vunpack.c.h.s8.bf16 %v894_v41 }
 0x8d8   : > { %v1720_v53 = vpop.permute.xlu0 %1719 }
 0x8d9   : > { %v1621_v45 = vpack.c.bf16 %v1619_v43, %v1619_v43  ;;  %v1975_v43 = vunpack.c.l.s8.bf16 %v894_v41 }
 0x8db   : > { %2783 = vmatmul.mubr.msk.bf16.vlgmr.msra.gmra.mxu0 %vm1157_vm5, %v1621_v45  ;;  %v1974_v45 = vunpack.c.h.s8.bf16 %v893_v44 }
 0x8dc   : > { %2793 = vmatpush3.bf16.xpose.msra.mxu0 %v1727_v47  ;;  %2794 = vmatprep.mubr.msk.bf16.mxu0 %vm3045_vm1, %v3044_v46  ;;  %v1973_v47 = vunpack.c.l.s8.bf16 %v893_v44 }
 0x8dd   : > { %2804 = vmatprep.subr.bf16.mxu0 %v3044_v46 }
 0x8de   : > { %v2918_v15 = vpop.eup %2917 }
 0x8df   : > { %v1620_v48 = vmul.f32 %v2918_v15, %v2914_v37 }
 0x8e1   : > { %v1622_v52 = vpack.c.bf16 %v1620_v48, %v1620_v48 }
 0x8e3   : > { %2789 = vmatmul.mubr.msk.bf16.vlgmr.msra.gmra.mxu1 %vm1157_vm5, %v1622_v52  ;;  %2795 = vmatmul.mubr.msk.bf16.vlgmr.msra.gmra.mxu0 %vm1061_vm3, %v1720_v53 }
 0x8e4   : > { %2799 = vmatpush3.bf16.xpose.msra.mxu1 %v1777_v54  ;;  %2800 = vmatprep.mubr.msk.bf16.mxu1 %vm3045_vm1, %v3044_v46 }
 0x8e5   : > { %2810 = vmatprep.subr.bf16.mxu1 %v3044_v46  ;;  %2806 = vmatprep.mubr.msk.bf16.mxu0 %vm3045_vm1, %v3044_v46 }
 0x8eb   : > { %2801 = vmatmul.mubr.msk.bf16.vlgmr.msra.gmra.mxu1 %vm1061_vm3, %v1770_v55 }
 0x8ec   : > { %2812 = vmatprep.mubr.msk.bf16.mxu1 %vm3045_vm1, %v3044_v46 }
 0x99b   : > { %v1665_v56 = vpop.f32.mrf.mxu0 }
 0x99d   : > { %v2784_v57 = vpop.f32.mrf.mxu0 }
 0x99f   : > { %v1668_v58 = vpop.f32.mrf.mxu0 }
 0x9a1   : > { %v2785_v59 = vpop.f32.mrf.mxu0 }
 0x9a3   : > { %v1713_v61 = vpop.f32.mrf.mxu1  ;;  %v1763_v62 = vpop.f32.mrf.mxu0 }
 0x9a4   : > { %v1764_v1 = vadd.f32 %v1763_v62, %v3379_v23  ;;  %v2881_v27 = vpack.i.bf16 %v1713_v61, %v1665_v56 }
 0x9a5   : > { %v2790_v6 = vpop.f32.mrf.mxu1  ;;  %v2796_v10 = vpop.f32.mrf.mxu0 }
 0x9a6   : > { %v1819_v11 = vsel %vm1157_vm5, %v1764_v1, -inf }
 0x9a7   : > { %1820 = vmax.xlane.f32.xlu0 %v1819_v11  ;;  %v1716_v12 = vpop.f32.mrf.mxu1  ;;  %v1766_v13 = vpop.f32.mrf.mxu0 }
 0x9a9   : > { %v2791_v14 = vpop.f32.mrf.mxu1  ;;  %v2797_v16 = vpop.f32.mrf.mxu0 }
 0x9ab   : > { %v1813_v17 = vpop.f32.mrf.mxu1 }
 0x9ac   : > { %v1814_v20 = vadd.f32 %v1813_v17, %v3379_v23 }
 0x9ad   : > { %v2802_v22 = vpop.f32.mrf.mxu1 }
 0x9ae   : > { %v1822_v24 = vsel %vm1157_vm5, %v1814_v20, -inf  ;;  %v2636_v22 = vld [vmem:[%s3693_s4] ss:$0 sm:$0xff]  ;;  %s3698_s4 = scalar_lea.vmem %s3644_s15, %s3222_s29 }
 0x9af   : > { %1823 = vmax.xlane.f32.xlu1 %v1822_v24  ;;  %v1816_v25 = vpop.f32.mrf.mxu1 }
 0x9b1   : > { %v2803_v26 = vpop.f32.mrf.mxu1 }
 0x9c0   : > { %1891 = vrot.lane.b32.xlu1 %v3367_v18, %s3052_s19 }
 0x9c4   : > { %2877 = vrot.lane.b32.xlu1 %v2876_v9, %s3051_s28 }
 0x9c8   : > { %2882 = vrot.lane.b32.xlu1 %v2881_v27, %s3049_s26  ;;  %s3696_s26 = scalar_lea.vmem %s3641_s12, %s3210_s1 }
 0xa30   : > { %v1821_v28 = vpop.xlane.xlu0 %1820 }
 0xa31   : > { %v1825_v29 = vsub.f32 %v1764_v1, %v1821_v28 }
 0xa33   : > { %v1827_v23 = vmul.f32 1.442695, %v1825_v29 }
 0xa35   : > { %2919 = vpow2.f32 %v1827_v23 }
 0xa38   : > { %v1824_v30 = vpop.xlane.xlu1 %1823 }
 0xa39   : > { %v1826_v31 = vsub.f32 %v1814_v20, %v1824_v30 }
 0xa3b   : > { %v1829_v32 = vmul.f32 1.442695, %v1826_v31 }
 0xa3c   : > { %v1892_v33 = vpop.permute.xlu1 %1891 }
 0xa3d   : > { %2921 = vpow2.f32 %v1829_v32  ;;  %v1897_v34 = vsel %vm1185_vm2, %v1892_v33, 0 }
 0xa3e   : > { %2811 = vmatpush3.bf16.msra.mxu1 %v1897_v34 }
 0xa40   : > { %v2878_v57 = vpop.permute.xlu1 %2877 }
 0xa41   : > { %v2880_v59 = vunpack.i.h.bf16 %v2878_v57  ;;  %v2879_v61 = vunpack.i.l.bf16 %v2878_v57 }
 0xa42   : > { %v2920_v18 = vpop.eup %2919 }
 0xa43   : > { %v1831_v35 = vsel %vm1157_vm5, %v2920_v18, 0.0  ;;  %v1964_v6 = vsel %vm1061_vm3, %v3413_v7, %v2880_v59  ;;  %v1963_v10 = vsel %vm1061_vm3, %v3411_v0, %v2879_v61  ;;  %v2637_v0 = vld [vmem:[%s3694_s22] ss:$0 sm:$0xff] }
 0xa44   : > { %1832 = vadd.xlane.f32.xlu0 %v1831_v35  ;;  %v2883_v58 = vpop.permute.xlu1 %2882  ;;  %v2639_v59 = vld [vmem:[%s3696_s26] ss:$0 sm:$0xff] }
 0xa45   : > { %v2885_v62 = vunpack.i.h.bf16 %v2883_v58 }
 0xa47   : > { %v1967_v14 = vsel %vm1965_vm6, %v1964_v6, %v2885_v62  ;;  %v912_v6 = vld [vmem:[%s3280_s27 + $0x38] sm:$0xff] }
 0xa4a   : > { %v2922_v60 = vpop.eup %2921 }
 0xa4b   : > { %v1834_v4 = vsel %vm1157_vm5, %v2922_v60, 0.0 }
 0xa4c   : > { %1835 = vadd.xlane.f32.xlu0 %v1834_v4 }
 0xa62   : > { %1843 = vrot.lane.b32.xlu0 %v3348_v5, %s3052_s19  ;;  %s3697_s19 = scalar_lea.vmem %s3643_s14, %s3222_s29 }
 0xacd   : > { %v1833_v9 = vpop.xlane.xlu0 %1832 }
 0xace   : > { %2923 = vrcp.f32 %v1833_v9 }
 0xad5   : > { %v1836_v36 = vpop.xlane.xlu0 %1835 }
 0xad6   : > { %2925 = vrcp.f32 %v1836_v36 }
 0xad9   : > { %v1844_v63 = vpop.permute.xlu0 %1843 }
 0xada   : > { %v1849_v8 = vsel %vm1185_vm2, %v1844_v63, 0 }
 0xadb   : > { %v2924_v37 = vpop.eup %2923  ;;  %2805 = vmatpush3.bf16.msra.mxu0 %v1849_v8  ;;  %v902_v8 = vld [vmem:[%s3262_s0 + $0x18] sm:$0xff] }
 0xadc   : > { %v1839_v19 = vmul.f32 %v2924_v37, %v2920_v18  ;;  %2816 = vmatprep.subr.bf16.mxu0 %v3044_v46  ;;  %v2094_v37 = vunpack.c.h.s8.bf16 %v902_v8 }
 0xade   : > { %v1841_v38 = vpack.c.bf16 %v1839_v19, %v1839_v19  ;;  %v901_v19 = vld [vmem:[%s3262_s0 + $0x10] sm:$0xff]  ;;  %2106 = vmatprep.subr.bf16.mxu1 %v2094_v37 }
 0xae0   : > { %2807 = vmatmul.mubr.msk.bf16.vlgmr.msra.gmra.mxu0 %vm1157_vm5, %v1841_v38  ;;  %v2093_v38 = vunpack.c.h.s8.bf16 %v901_v19 }
 0xae1   : > { %2824 = vmatprep.mubr.msk.bf16.mxu0 %vm3045_vm1, %v3044_v46  ;;  %2817 = vmatpush3.bf16.msra.mxu0 %v1976_v42  ;;  %v899_v42 = vld [vmem:[%s3262_s0] sm:$0xff] }
 0xae2   : > { %2818 = vmatprep.subr.bf16.mxu0 %v3044_v46 }
 0xae3   : > { %v2926_v5 = vpop.eup %2925 }
 0xae4   : > { %v1840_v39 = vmul.f32 %v2926_v5, %v2922_v60  ;;  %v2092_v5 = vunpack.c.l.s8.bf16 %v902_v8 }
 0xae5   : > { %2819 = vmatpush3.bf16.msra.mxu0 %v1975_v43  ;;  %v2089_v43 = vunpack.c.h.s8.bf16 %v899_v42 }
 0xae6   : > { %v1842_v40 = vpack.c.bf16 %v1840_v39, %v1840_v39  ;;  %2820 = vmatprep.subr.bf16.mxu0 %v3044_v46  ;;  %v2091_v39 = vunpack.c.l.s8.bf16 %v901_v19 }
 0xae8   : > { %2813 = vmatmul.mubr.msk.bf16.vlgmr.msra.gmra.mxu1 %vm1157_vm5, %v1842_v40  ;;  %v900_v40 = vld [vmem:[%s3262_s0 + $0x8] sm:$0xff]  ;;  %s3700_s0 = sld [smem:[#allocation15_spill]] }
 0xae9   : > { %2130 = vmatprep.mubr.bf16.mxu1 %v3043_v21  ;;  %2821 = vmatpush3.bf16.msra.mxu0 %v1974_v45  ;;  %v2090_v41 = vunpack.c.h.s8.bf16 %v900_v40  ;;  %v2088_v44 = vunpack.c.l.s8.bf16 %v900_v40  ;;  %v2087_v45 = vunpack.c.l.s8.bf16 %v899_v42 }
 0xaea   : > { %2822 = vmatprep.subr.bf16.mxu0 %v3044_v46  ;;  %v2884_v46 = vunpack.i.l.bf16 %v2883_v58  ;;  %2107 = vmatpush1.bf16.msra.mxu1 %v2093_v38 }
 0xaeb   : > { %2108 = vmatprep.subr.bf16.mxu1 %v2092_v5 }
 0xaec   : > { %v1966_v13 = vsel %vm1965_vm6, %v1963_v10, %v2884_v46  ;;  %v2234_v10 = vunpack.c.h.s8.bf16 %v912_v6 }
 0xaed   : > { %2823 = vmatpush3.bf16.msra.mxu0 %v1973_v47 }
 0xaee   : > { %2109 = vmatpush1.bf16.msra.mxu1 %v2091_v39  ;;  %2698 = vmatprep.subr.bf16.mxu0 %v2234_v10  ;;  %p2645_p6 = scmp.ne.s32.totalorder %s3700_s0, 1 }
 0xaef   : > { %2110 = vmatprep.subr.bf16.mxu1 %v2090_v41 }
 0xaf2   : > { %2111 = vmatpush1.bf16.msra.mxu1 %v2089_v43 }
 0xaf3   : > { %2112 = vmatprep.subr.bf16.mxu1 %v2088_v44 }
 0xaf6   : > { %2113 = vmatpush1.bf16.msra.mxu1 %v2087_v45 }
 0xba0   : > { %v1885_v15 = vpop.f32.mrf.mxu0 }
 0xba2   : > { %v2808_v48 = vpop.f32.mrf.mxu0 }
 0xba4   : > { %v1888_v50 = vpop.f32.mrf.mxu0 }
 0xba6   : > { %v2809_v21 = vpop.f32.mrf.mxu0 }
 0xba8   : > { %v1933_v52 = vpop.f32.mrf.mxu1 }
 0xba9   : > { %v2886_v53 = vpack.i.bf16 %v1933_v52, %v1885_v15 }
 0xbaa   : > { %v2814_v54 = vpop.f32.mrf.mxu1 }
 0xbab   : > { %2887 = vrot.lane.b32.xlu0 %v2886_v53, %s3047_s2 }
 0xbac   : > { %v1936_v55 = vpop.f32.mrf.mxu1 }
 0xbad   : > { %v2638_v55 = vld [vmem:[%s3695_s20] ss:$0 sm:$0xff] }
 0xbae   : > { %v2815_v56 = vpop.f32.mrf.mxu1 }
 0xc1d   : > { %v2888_v1 = vpop.permute.xlu0 %2887 }
 0xc1e   : > { %v2890_v11 = vunpack.i.h.bf16 %v2888_v1  ;;  %v2889_v12 = vunpack.i.l.bf16 %v2888_v1 }
 0xc20   : > { %v1970_v16 = vsel %vm1968_vm7, %v1967_v14, %v2890_v11  ;;  %v1969_v17 = vsel %vm1968_vm7, %v1966_v13, %v2889_v12  ;;  %v908_v11 = vld [vmem:[%s3280_s27 + $0x18] sm:$0xff]  ;;  %v2233_v13 = vunpack.c.l.s8.bf16 %v912_v6 }
 0xc21   : > { %v2658_v20 = vpack.c.bf16 %v1970_v16, %v1969_v17  ;;  %v2226_v12 = vunpack.c.h.s8.bf16 %v908_v11  ;;  %v2225_v14 = vunpack.c.l.s8.bf16 %v908_v11  ;;  %v911_v16 = vld [vmem:[%s3280_s27 + $0x30] sm:$0xff] }
 0xc22   : > { %v907_v17 = vld [vmem:[%s3280_s27 + $0x10] sm:$0xff] }
 0xc23   : > { %2825 = vmatmul.mubr.msk.bf16.vlgmr.msra.gmra.mxu0 %vm921_vm0, %v2658_v20  ;;  %v2232_v20 = vunpack.c.h.s8.bf16 %v911_v16 }
 0xc24   : > { %2699 = vmatpush3.bf16.msra.mxu0 %v2226_v12 }
 0xc25   : > { %2700 = vmatprep.subr.bf16.mxu0 %v2233_v13 }
 0xc28   : > { %2701 = vmatpush3.bf16.msra.mxu0 %v2225_v14 }
 0xc29   : > { %2702 = vmatprep.subr.bf16.mxu0 %v2232_v20 }
 0xce3   : > { %v2019_v24 = vpop.f32.mrf.mxu0 }
 0xce4   : > { %v2032_v25 = vmul.f32 %v2636_v22, %v2019_v24  ;;  %v2231_v24 = vunpack.c.l.s8.bf16 %v911_v16 }
 0xce5   : > { %v2826_v7 = vpop.f32.mrf.mxu0 }
 0xce6   : > { %v2034_v26 = vadd.f32 %v2032_v25, %v3294_v2  ;;  %v910_v25 = vld [vmem:[%s3280_s27 + $0x28] sm:$0xff] }
 0xce7   : > { %v2022_v27 = vpop.f32.mrf.mxu0  ;;  %v2230_v7 = vunpack.c.h.s8.bf16 %v910_v25 }
 0xce8   : > { %v3542_v28 = vadd.f32 %v2637_v0, %v2034_v26  ;;  %v2033_v29 = vmul.f32 %v2636_v22, %v2022_v27  ;;  %v2224_v22 = vunpack.c.h.s8.bf16 %v907_v17  ;;  %v906_v26 = vld [vmem:[%s3280_s27 + $0x8] sm:$0xff] }
 0xce9   : > { %v2827_v23 = vpop.f32.mrf.mxu0  ;;  %v2222_v27 = vunpack.c.h.s8.bf16 %v906_v26 }
 0xcea   : > { %v2035_v30 = vadd.f32 %v2033_v29, %v3296_v3  ;;  %v2044_v31 = vsel %vm921_vm0, %v3542_v28, 0.0  ;;  %2703 = vmatpush3.bf16.msra.mxu0 %v2224_v22  ;;  %v2229_v29 = vunpack.c.l.s8.bf16 %v910_v25  ;;  %v909_v23 = vld [vmem:[%s3280_s27 + $0x20] sm:$0xff] }
 0xceb   : > { %2045 = vadd.xlane.f32.xlu1 %v2044_v31  ;;  %2704 = vmatprep.subr.bf16.mxu0 %v2231_v24  ;;  %v2228_v31 = vunpack.c.h.s8.bf16 %v909_v23 }
 0xcec   : > { %v3547_v32 = vadd.f32 %v2637_v0, %v2035_v30  ;;  %v2223_v0 = vunpack.c.l.s8.bf16 %v907_v17  ;;  %v2221_v30 = vunpack.c.l.s8.bf16 %v906_v26 }
 0xcee   : > { %v2047_v33 = vsel %vm921_vm0, %v3547_v32, 0.0  ;;  %2705 = vmatpush3.bf16.msra.mxu0 %v2223_v0 }
 0xcef   : > { %2048 = vadd.xlane.f32.xlu0 %v2047_v33  ;;  %2706 = vmatprep.subr.bf16.mxu0 %v2230_v7  ;;  %v905_v33 = vld [vmem:[%s3280_s27] sm:$0xff] }
 0xcf2   : > { %2707 = vmatpush3.bf16.msra.mxu0 %v2222_v27 }
 0xcf3   : > { %2708 = vmatprep.subr.bf16.mxu0 %v2229_v29 }
 0xcf6   : > { %2709 = vmatpush3.bf16.msra.mxu0 %v2221_v30 }
 0xcf7   : > { %2710 = vmatprep.subr.bf16.mxu0 %v2228_v31  ;;  %v2643_v31 = vld [vmem:[%s825_s23] ss:$0 sm:$0xff] }
 0xd74   : > { %v2046_v2 = vpop.xlane.xlu1 %2045 }
 0xd75   : > { %v2050_v34 = vmul.f32 0.015625, %v2046_v2  ;;  %v2220_v2 = vunpack.c.h.s8.bf16 %v905_v33 }
 0xd77   : > { %v2052_v18 = vsub.f32 %v3542_v28, %v2050_v34  ;;  %v2227_v34 = vunpack.c.l.s8.bf16 %v909_v23  ;;  %2711 = vmatpush3.bf16.msra.mxu0 %v2220_v2 }
 0xd78   : > { %v2049_v35 = vpop.xlane.xlu0 %2048 }
 0xd79   : > { %v2051_v60 = vmul.f32 0.015625, %v2049_v35  ;;  %v2054_v4 = vmul.f32 %v2052_v18, %v2052_v18  ;;  %2712 = vmatprep.subr.bf16.mxu0 %v2227_v34  ;;  %v903_v35 = vld [vmem:[%s3697_s19] sm:$0x3] }
 0xd7b   : > { %v2053_v3 = vsub.f32 %v3547_v32, %v2051_v60  ;;  %v2056_v9 = vsel %vm921_vm0, %v2054_v4, 0.0  ;;  %v904_v60 = vld [vmem:[%s3698_s4] sm:$0x3]  ;;  %v2145_v4 = vrot.slane %v903_v35, %v3324_v49 }
 0xd7c   : > { %2057 = vadd.xlane.f32.xlu0 %v2056_v9  ;;  %v2149_v9 = vrot.slane %v903_v35, %v3331_v51  ;;  %v2164_v8 = vrot.slane %v904_v60, %v3331_v51  ;;  %v2644_v35 = vld [vmem:[%s828_s8] ss:$0 sm:$0xff] }
 0xd7d   : > { %v2055_v36 = vmul.f32 %v2053_v3, %v2053_v3 }
 0xd7f   : > { %v2059_v63 = vsel %vm921_vm0, %v2055_v36, 0.0 }
 0xd80   : > { %2060 = vadd.xlane.f32.xlu0 %v2059_v63 }
 0xe05   : > { %v2058_v47 = vpop.xlane.xlu0 %2057 }
 0xe06   : > { %v2062_v15 = vmul.f32 0.015625, %v2058_v47 }
 0xe08   : > { %v2064_v48 = vadd.f32 1e-05, %v2062_v15 }
 0xe09   : > { %v2061_v50 = vpop.xlane.xlu0 %2060 }
 0xe0a   : > { %2927 = vrsqrt.f32 %v2064_v48  ;;  %v2063_v21 = vmul.f32 0.015625, %v2061_v50 }
 0xe0c   : > { %v2065_v52 = vadd.f32 1e-05, %v2063_v21 }
 0xe0e   : > { %2929 = vrsqrt.f32 %v2065_v52 }
 0xe17   : > { %v2928_v53 = vpop.eup %2927 }
 0xe18   : > { %v2068_v54 = vmul.f32 %v2928_v53, %v2052_v18  ;;  %v2219_v18 = vunpack.c.l.s8.bf16 %v905_v33 }
 0xe1a   : > { %v2076_v58 = vmul.f32 %v2638_v55, %v2068_v54  ;;  %2713 = vmatpush3.bf16.msra.mxu0 %v2219_v18 }
 0xe1b   : > { %v2930_v56 = vpop.eup %2929 }
 0xe1c   : > { %v2069_v57 = vmul.f32 %v2930_v56, %v2053_v3  ;;  %v2084_v62 = vadd.f32 %v2639_v59, %v2076_v58  ;;  %v2160_v3 = vrot.slane %v904_v60, %v3324_v49 }
 0xe1e   : > { %v2077_v61 = vmul.f32 %v2638_v55, %v2069_v57 }
 0xe20   : > { %v2085_v46 = vadd.f32 %v2639_v59, %v2077_v61 }
 0xe22   : > { %v2086_v1 = vpack.c.bf16 %v2085_v46, %v2084_v62 }
 0xe24   : > { %2640 = vmatmul.mubr.msk.bf16.vlgmr.msra.gmra.mxu1 %vm921_vm0, %v2086_v1 }
 0xee4   : > { %v2132_v36 = vpop.f32.mrf.mxu1 }
 0xee5   : > { %v2152_v63 = vmul.f32 %v2145_v4, %v2132_v36 }
 0xee6   : > { %v2134_v37 = vpop.f32.mrf.mxu1 }
 0xee7   : > { %v2167_v19 = vadd.f32 %v2160_v3, %v2152_v63  ;;  %v2153_v38 = vmul.f32 %v2149_v9, %v2134_v37 }
 0xee8   : > { %v2136_v5 = vpop.f32.mrf.mxu1 }
 0xee9   : > { %v2175_v39 = vmul.f32 0.044715, %v2167_v19  ;;  %v2168_v40 = vadd.f32 %v2164_v8, %v2153_v38  ;;  %v2154_v41 = vmul.f32 %v2145_v4, %v2136_v5  ;;  %v2171_v25 = vmul.f32 0.5, %v2167_v19 }
 0xeea   : > { %v2138_v42 = vpop.f32.mrf.mxu1 }
 0xeeb   : > { %v2179_v43 = vmul.f32 %v2175_v39, %v2167_v19  ;;  %v2176_v44 = vmul.f32 0.044715, %v2168_v40  ;;  %v2169_v45 = vadd.f32 %v2160_v3, %v2154_v41  ;;  %v2155_v47 = vmul.f32 %v2149_v9, %v2138_v42 }
 0xeec   : > { %v2172_v20 = vmul.f32 0.5, %v2168_v40 }
 0xeed   : > { %v2183_v15 = vmul.f32 %v2179_v43, %v2167_v19  ;;  %v2180_v49 = vmul.f32 %v2176_v44, %v2168_v40  ;;  %v2177_v48 = vmul.f32 0.044715, %v2169_v45  ;;  %v2170_v50 = vadd.f32 %v2164_v8, %v2155_v47 }
 0xeee   : > { %v2173_v16 = vmul.f32 0.5, %v2169_v45 }
 0xeef   : > { %v2187_v21 = vadd.f32 %v2183_v15, %v2167_v19  ;;  %v2181_v52 = vmul.f32 %v2177_v48, %v2169_v45  ;;  %v2178_v53 = vmul.f32 0.044715, %v2170_v50  ;;  %v2184_v51 = vmul.f32 %v2180_v49, %v2168_v40 }
 0xef0   : > { %v2174_v22 = vmul.f32 0.5, %v2170_v50 }
 0xef1   : > { %v2185_v54 = vmul.f32 %v2181_v52, %v2169_v45  ;;  %v2182_v55 = vmul.f32 %v2178_v53, %v2170_v50  ;;  %v2191_v56 = vmul.f32 0.7978846, %v2187_v21  ;;  %v2188_v57 = vadd.f32 %v2184_v51, %v2168_v40 }
 0xef3   : > { %v2189_v58 = vadd.f32 %v2185_v54, %v2169_v45  ;;  %v2186_v59 = vmul.f32 %v2182_v55, %v2170_v50  ;;  %v2192_v61 = vmul.f32 0.7978846, %v2188_v57  ;;  %2931 = vtanh.f32 %v2191_v56 }
 0xef5   : > { %v2190_v62 = vadd.f32 %v2186_v59, %v2170_v50  ;;  %v2193_v46 = vmul.f32 0.7978846, %v2189_v58  ;;  %2933 = vtanh.f32 %v2192_v61 }
 0xef7   : > { %v2194_v1 = vmul.f32 0.7978846, %v2190_v62  ;;  %2935 = vtanh.f32 %v2193_v46 }
 0xef9   : > { %2937 = vtanh.f32 %v2194_v1 }
 0xf00   : > { %v2932_v6 = vpop.eup %2931 }
 0xf01   : > { %v2199_v17 = vadd.f32 1.0, %v2932_v6 }
 0xf02   : > { %v2934_v10 = vpop.eup %2933 }
 0xf03   : > { %v2200_v12 = vadd.f32 1.0, %v2934_v10  ;;  %v2203_v27 = vmul.f32 %v2199_v17, %v2171_v25 }
 0xf04   : > { %v2936_v11 = vpop.eup %2935 }
 0xf05   : > { %v2201_v13 = vadd.f32 1.0, %v2936_v11  ;;  %v2204_v7 = vmul.f32 %v2200_v12, %v2172_v20 }
 0xf06   : > { %v2938_v14 = vpop.eup %2937 }
 0xf07   : > { %v2202_v24 = vadd.f32 1.0, %v2938_v14  ;;  %v2205_v0 = vmul.f32 %v2201_v13, %v2173_v16 }
 0xf09   : > { %v2206_v26 = vmul.f32 %v2202_v24, %v2174_v22  ;;  %v2659_v23 = vpack.c.bf16 %v2205_v0, %v2203_v27 }
 0xf0b   : > { %v2660_v29 = vpack.c.bf16 %v2206_v26, %v2204_v7 }
 0xf0d   : > { %2271 = vmatprep.mubr.bf16.mxu0 %v2660_v29 }
 0xf0e   : > { %2272 = vmatmul.mubr.bf16.vlgmr.msra.gmra.mxu0 %v2659_v23 }
 0xfce   : > { %v2714_v30 = vpop.f32.mrf.mxu0 }
 0xfd0   : > { %v2715_v33 = vpop.f32.mrf.mxu0 }
 0xfd1   : > { %v2716_v2 = vadd.f32 %v2715_v33, %v2714_v30 }
 0xfd2   : > { %v2717_v34 = vpop.f32.mrf.mxu0 }
 0xfd3   : > { %v2286_v18 = vmul.f32 %v2716_v2, %v2643_v31 }
 0xfd4   : > { %v2718_v60 = vpop.f32.mrf.mxu0 }
 0xfd5   : > { %v2288_v4 = vadd.f32 %v2286_v18, %v3542_v28  ;;  %v2719_v3 = vadd.f32 %v2718_v60, %v2717_v34 }
 0xfd7   : > { %v2296_v9 = vadd.f32 %v2644_v35, %v2288_v4  ;;  %v2287_v36 = vmul.f32 %v2719_v3, %v2643_v31  ;;  %2301 = sbr.rel (%p2645_p6) target bundleno = 4373 (0x1115), region = 142 }
 0xfd9   : > { %v2289_v63 = vadd.f32 %v2287_v36, %v3547_v32 }
 0xfdb   : > { %v2297_v8 = vadd.f32 %v2644_v35, %v2289_v63 }
 0xfdc   : > { %v2304_v37 = vsel %vm921_vm0, %v2296_v9, 0.0  ;;  %v2646_v52 = vld [vmem:[#allocation3] ss:$0 sm:$0xff]  ;;  %v2647_v51 = vld [vmem:[#allocation6] ss:$0 sm:$0xff] }
 0xfdd   : > { %2305 = vadd.xlane.f32.xlu0 %v2304_v37  ;;  %v2307_v19 = vsel %vm921_vm0, %v2297_v8, 0.0 }
 0xfe1   : > { %2308 = vadd.xlane.f32.xlu0 %v2307_v19 }
0x1066   : > { %v2306_v38 = vpop.xlane.xlu0 %2305 }
0x1067   : > { %v2310_v5 = vmul.f32 0.015625, %v2306_v38 }
0x1069   : > { %v2312_v39 = vsub.f32 %v2296_v9, %v2310_v5 }
0x106a   : > { %v2309_v40 = vpop.xlane.xlu0 %2308 }
0x106b   : > { %v2311_v28 = vmul.f32 0.015625, %v2309_v40  ;;  %v2314_v41 = vmul.f32 %v2312_v39, %v2312_v39 }
0x106d   : > { %v2313_v42 = vsub.f32 %v2297_v8, %v2311_v28  ;;  %v2316_v43 = vsel %vm921_vm0, %v2314_v41, 0.0 }
0x106e   : > { %2317 = vadd.xlane.f32.xlu1 %v2316_v43 }
0x106f   : > { %v2315_v32 = vmul.f32 %v2313_v42, %v2313_v42 }
0x1071   : > { %v2319_v44 = vsel %vm921_vm0, %v2315_v32, 0.0 }
0x1072   : > { %2320 = vadd.xlane.f32.xlu1 %v2319_v44 }
0x10f7   : > { %v2318_v45 = vpop.xlane.xlu1 %2317 }
0x10f8   : > { %v2322_v47 = vmul.f32 0.015625, %v2318_v45 }
0x10fa   : > { %v2324_v15 = vadd.f32 1e-05, %v2322_v47 }
0x10fb   : > { %v2321_v49 = vpop.xlane.xlu1 %2320 }
0x10fc   : > { %2939 = vrsqrt.f32 %v2324_v15  ;;  %v2323_v48 = vmul.f32 0.015625, %v2321_v49 }
0x10fe   : > { %v2325_v50 = vadd.f32 1e-05, %v2323_v48 }
0x1100   : > { %2941 = vrsqrt.f32 %v2325_v50 }
0x1109   : > { %v2940_v21 = vpop.eup %2939 }
0x110a   : > { %v2328_v53 = vmul.f32 %v2940_v21, %v2312_v39 }
0x110c   : > { %v2336_v54 = vmul.f32 %v2646_v52, %v2328_v53 }
0x110d   : > { %v2942_v55 = vpop.eup %2941 }
0x110e   : > { %v2344_v56 = vadd.f32 %v2647_v51, %v2336_v54  ;;  %v2329_v57 = vmul.f32 %v2942_v55, %v2313_v42 }
0x1110   : > { %2346 = vst.msk [vmem:[#allocation8] sm:$0xff] %vm921_vm0, %v2344_v56  ;;  %v2337_v58 = vmul.f32 %v2646_v52, %v2329_v57 }
0x1112   : > { %v2345_v59 = vadd.f32 %v2647_v51, %v2337_v58 }
0x1114   : > { %2347 = vst.msk [vmem:[#allocation8 + $0x8] sm:$0xff] %vm921_vm0, %v2345_v59 }
0x1115 PF: > { %s3701_s8 = sld [smem:[#allocation15_spill]] }
0x111b   : > { %p2648_p13 = scmp.ge.s32.totalorder %s3701_s8, 1 }
0x111d   : > { %2351 = sbr.rel (%p2648_p13) target bundleno = 4387 (0x1123), region = 146 }
0x1122   : > { %2352 = vst.msk [vmem:[#allocation8] sm:$0xff] %vm921_vm0, %v2296_v9  ;;  %2353 = vst.msk [vmem:[#allocation8 + $0x8] sm:$0xff] %vm921_vm0, %v2297_v8 }
0x1123 PF: > { %s3702_s1 = sld [smem:[#allocation15_spill]]  ;;  %s3053_s23 = smov [#allocation8]  }
0x1124   : > { %s2360_s24 = sshll.u32 %s3053_s23, 4  ;;  %s2361_s24 = int_to_ptr.vmem [resolvable:$true] %s2360_s24 }
0x1125   : > { %s2995_s20 = scalar_lea.vmem %s2361_s24, 256  ;;  %p3002_p9 = scmp.lt.s32.totalorder %s2361_s24, %s2361_s24 }
0x1126   : > { %p2996_p1 = scmp.ne.s32.totalorder %s2361_s24, %s2995_s20  ;;  %p3003_p11 = scmp.lt.s32.totalorder %s2995_s20, %s2995_s20 }
0x1128   : > { %p3004_p10 = por %p3003_p11, %p3002_p9 }
0x1129   : > { %p2851_p0 = scmp.eq.s32.totalorder %s3702_s1, 1 }
0x112b   : > { %p2997_p5 = pnand %p2996_p1, %p2851_p0 }
0x112d   : > { %p2998_p8 = pneg %p2997_p5 }
0x112f   : > { %p3005_p7 = pnand %p3004_p10, %p2998_p8 }
0x1131   : > { %3008 = shalt.err (!%p3005_p7)
}
0x1132   : > { %s3054_s2 = smov 128   ;;  %s3055_s3 = smov 8  }
0x1133   : > { %s3703_s28 = sld [smem:[#allocation26_spill]] }
0x1139   : > { %2837 = dma.vmem_to_hbm [thread:$0]  (%p2851_p0), %s2361_s24, 256, %s3703_s28, [#allocation5], %s3054_s2, %s3054_s2, %s3055_s3  }
0x113a   : > { %3034 = dma.done.wait (%p2851_p0), [#allocation5], 256  }
0x113b   : > { %3036 = vsyncadd (%p2851_p0), [#allocation5], 4294967040 }
0x113c PF: > { %s3704_s19 = sld [smem:[#allocation14_spill]] }
0x1142   : > { %s32_s0 = sadd.s32 1, %s3704_s19  }
0x1143   : > { %p29_p12 = scmp.ge.s32.totalorder %s32_s0, 4  }
0x1145   :  { %31 = sbr.rel (!%p29_p12) target bundleno = 14 (0xe), region = 227 }
0x114a   :  { %2376 = vsyncpa [#allocation4], 1 }
0x114b   :  { %2378 = vsyncpa [#allocation4 + $0x1], 1 }
0x114c   :  { %2379 = vsyncpa [#allocation7], 1 }
0x114d   :  { %2380 = vsyncpa [#allocation5], 1 }
0x114e   :  { %2382 = vsyncpa [#allocation5 + $0x1], 1 }
0x114f   :  { %2383 = vsyncmov [#allocation2] }
0x1152   :  { %s2384_s21 = vpop.sfrf %2383 }
0x1153   :  { %p2653_p2 = scmp.ne.s32.totalorder %s2384_s21, 0 }
0x1155   :  { %2388 = shalt.err (%p2653_p2)  }

</bundles_post_ra>
